<compile_context>
chip_gen: v5e
topology: v5e:2x2
jax: 0.10.0
libtpu: 0.0.40
codegen_flags: <defaults>
</compile_context>

<pallas_src>
import jax
import jax.numpy as jnp
from jax import lax
from jax.experimental import pallas as pl
from jax.experimental.pallas import tpu as pltpu


def _conv_bn_relu_fullframe(a, w, shift, *, K, W, out_len, mxu_dtype):
    """One Conv(BN-scale-folded) + shift + ReLU on a full-frame flat activation.

    a:     (Cin, in_len)  f32, flat channel-major (C, N*H*W + trailing zero/junk pad)
    w:     (K, K, Cout, Cin) f32, BN scale already folded in
    shift: (Cout, 1) f32  (beta - running_mean * scale)
    returns (Cout, out_len) f32 with out_len = in_len - (K-1)*(W+1); the right/bottom
    (K-1)-wide margins of each image are junk, everything else is the exact conv.
    """
    cout = w.shape[2]
    am = a.astype(mxu_dtype)           # cast once per layer (MXU operands only)
    wm = w.astype(mxu_dtype)
    acc = jnp.zeros((cout, out_len), jnp.float32)
    for kh in range(K):
        for kw in range(K):
            off = kh * W + kw          # flat shift of tap (kh, kw): contiguous window
            acc = acc + jnp.dot(wm[kh, kw], am[:, off:off + out_len],
                                preferred_element_type=jnp.float32)
    return jnp.maximum(acc + shift, 0.0)   # BN shift + ReLU, f32 epilogue


def _make_fused_kernel(num_layers, K, W, M, pad, mxu_dtype):
    def kernel(*refs):
        # refs = (x_ref, w_0, shift_0, ..., w_{L-1}, shift_{L-1}, o_ref)
        x_ref, o_ref = refs[0], refs[-1]
        a = x_ref[...]                                  # (Cin, M + num_layers*pad)
        for l in range(num_layers):
            w_ref, s_ref = refs[1 + 2 * l], refs[2 + 2 * l]
            out_len = M + (num_layers - 1 - l) * pad    # shrinks by `pad` per layer
            a = _conv_bn_relu_fullframe(a, w_ref[...], s_ref[...],
                                        K=K, W=W, out_len=out_len,
                                        mxu_dtype=mxu_dtype)
        o_ref[...] = a.astype(o_ref.dtype)              # (Cout, M), lane-dense store
    return kernel


def _fold_bn_into_conv(p, eps=1e-5):
    """Fold eval-mode BatchNorm scale into the conv weight; return kernel operands."""
    scale = p["gamma"] / jnp.sqrt(p["running_var"] + eps)          # (Cout,)
    shift = p["beta"] - p["running_mean"] * scale                  # (Cout,)
    w = p["w_oihw"] * scale[:, None, None, None]                   # (Cout, Cin, K, K)
    w_kkoc = jnp.transpose(w, (2, 3, 0, 1)).astype(jnp.float32)    # (K, K, Cout, Cin)
    return w_kkoc, shift[:, None].astype(jnp.float32)              # (Cout, 1)


def cnn_blocks_forward(x_nchw, params, *, stride=1, padding=0,
                       mxu_dtype=jnp.bfloat16, eps=1e-5):
    """CNNBlocks.forward (eval-mode BN): NCHW in, NCHW out, single fused kernel."""
    assert stride == 1 and padding == 0  # TODO(synk): see module header.
    N, Cin, H, W = x_nchw.shape
    L = len(params)
    K = params[0]["w_oihw"].shape[-1]
    Cout = params[-1]["w_oihw"].shape[0]
    H_out, W_out = H - L * (K - 1), W - L * (K - 1)
    assert H_out > 0 and W_out > 0

    M = N * H * W                   # flat spatial length (lane axis), 512 here
    pad = (K - 1) * (W + 1)         # max flat tap offset = junk margin per layer

    # Channel-major, flat spatial, zero-padded so every tap slice of every layer
    # stays in bounds (padding / cropping is XLA-side layout plumbing).
    x_flat = jnp.transpose(x_nchw, (1, 0, 2, 3)).reshape(Cin, M)
    x_work = jnp.concatenate(
        [x_flat, jnp.zeros((Cin, L * pad), x_flat.dtype)], axis=-1)

    operands = [x_work]
    in_specs = [pl.BlockSpec(x_work.shape, lambda i: (0, 0))]
    for p in params:
        assert p["w_oihw"].shape[-1] == K
        w_kkoc, shift = _fold_bn_into_conv(p, eps)
        operands += [w_kkoc, shift]
        in_specs += [pl.BlockSpec(w_kkoc.shape, lambda i: (0, 0, 0, 0)),
                     pl.BlockSpec(shift.shape, lambda i: (0, 0))]

    kernel = _make_fused_kernel(L, K, W, M, pad, mxu_dtype)
    out_flat = pl.pallas_call(
        kernel,
        out_shape=jax.ShapeDtypeStruct((Cout, M), jnp.float32),
        grid=(1,),   # whole problem (<0.1 MiB) runs in one VMEM-resident step
        in_specs=in_specs,
        out_specs=pl.BlockSpec((Cout, M), lambda i: (0, 0)),
        compiler_params=pltpu.CompilerParams(
            dimension_semantics=("arbitrary",)),
    )(*operands)

    # Crop the junk right/bottom margins and go back to PyTorch NCHW.
    out = out_flat.reshape(Cout, N, H, W)[:, :, :H_out, :W_out]
    return jnp.transpose(out, (1, 0, 2, 3))


def init_cnn_blocks_params(key, in_channels, out_channels, num_layers=2,
                           kernel_size=3):
    """PyTorch-style parameters/buffers for CNNBlocks (fresh-init BN buffers)."""
    params = []
    cin = in_channels
    for _ in range(num_layers):
        key, wk = jax.random.split(key)
        params.append(dict(
            w_oihw=jax.random.normal(
                wk, (out_channels, cin, kernel_size, kernel_size),
                dtype=jnp.float32) * 0.1,
            gamma=jnp.ones((out_channels,), jnp.float32),
            beta=jnp.zeros((out_channels,), jnp.float32),
            running_mean=jnp.zeros((out_channels,), jnp.float32),
            running_var=jnp.ones((out_channels,), jnp.float32),
        ))
        cin = out_channels
    return params


def reference_forward(x, params, eps=1e-5):
    """Pure-JAX (XLA) eval-mode CNNBlocks forward in f32, for correctness checks."""
    for p in params:
        x = lax.conv_general_dilated(
            x, p["w_oihw"], window_strides=(1, 1), padding="VALID",
            dimension_numbers=("NCHW", "OIHW", "NCHW"),
            precision=lax.Precision.HIGHEST)
        scale = p["gamma"] / jnp.sqrt(p["running_var"] + eps)
        shift = p["beta"] - p["running_mean"] * scale
        x = jnp.maximum(
            x * scale[None, :, None, None] + shift[None, :, None, None], 0.0)
    return x


if __name__ == "__main__":
    key = jax.random.PRNGKey(0)
    key, xk = jax.random.split(key)

    # CNNBlocks(in_channels=4, out_channels=8, num_layers=2, kernel_size=3,
    #           stride=1, padding=0), eval mode.
    N, C_in, H, W = 2, 4, 16, 16
    C_out, num_layers, K = 8, 2, 3

    x = jax.random.normal(xk, (N, C_in, H, W), dtype=jnp.float32)
    params = init_cnn_blocks_params(key, C_in, C_out, num_layers=num_layers,
                                    kernel_size=K)

    # Default fast path: bf16 MXU operands, f32 accumulation + f32 epilogue.
    out = jax.block_until_ready(cnn_blocks_forward(x, params))
    # Exact-semantics path: f32 MXU operands.
    out_f32 = jax.block_until_ready(
        cnn_blocks_forward(x, params, mxu_dtype=jnp.float32))

    H_out = H - num_layers * (K - 1)
    W_out = W - num_layers * (K - 1)
    assert out.shape == (N, C_out, H_out, W_out), out.shape
    assert bool(jnp.all(out >= 0.0))  # ReLU output is non-negative.

    ref = reference_forward(x, params)
    err_f32 = float(jnp.max(jnp.abs(out_f32 - ref)))
    err_bf16 = float(jnp.max(jnp.abs(out - ref)))
    assert err_f32 < 2e-2, f"f32 path mismatch vs reference: {err_f32}"
    assert err_bf16 < 7.5e-2, f"bf16 path mismatch vs reference: {err_bf16}"
    print("KERNEL_OK")
</pallas_src>

<mosaic_0001>
module attributes {stable_mosaic.version = 11 : i64} {
  func.func @kernel(%arg0: i32, %arg1: memref<4x580xf32, #tpu.memory_space<vmem>>, %arg2: memref<3x3x8x4xf32, #tpu.memory_space<vmem>>, %arg3: memref<8x1xf32, #tpu.memory_space<vmem>>, %arg4: memref<3x3x8x8xf32, #tpu.memory_space<vmem>>, %arg5: memref<8x1xf32, #tpu.memory_space<vmem>>, %arg6: memref<8x512xf32, #tpu.memory_space<vmem>>) attributes {dimension_semantics = [#tpu.dimension_semantics<arbitrary>], iteration_bounds = array<i64: 1>, scalar_prefetch = 0 : i64, scratch_operands = 0 : i64, tpu.core_type = #tpu.core_type<tc>, window_params = [{pipeline_mode = #tpu.pipeline_mode<synchronous>, transform_indices = @transform_0, window_bounds = array<i64: 4, 580>}, {pipeline_mode = #tpu.pipeline_mode<synchronous>, transform_indices = @transform_1, window_bounds = array<i64: 3, 3, 8, 4>}, {pipeline_mode = #tpu.pipeline_mode<synchronous>, transform_indices = @transform_2, window_bounds = array<i64: 8, 1>}, {pipeline_mode = #tpu.pipeline_mode<synchronous>, transform_indices = @transform_3, window_bounds = array<i64: 3, 3, 8, 8>}, {pipeline_mode = #tpu.pipeline_mode<synchronous>, transform_indices = @transform_4, window_bounds = array<i64: 8, 1>}, {pipeline_mode = #tpu.pipeline_mode<synchronous>, transform_indices = @transform_5, window_bounds = array<i64: 8, 512>}]} {
    %c0 = arith.constant 0 : index
    %c0_0 = arith.constant 0 : index
    %0 = vector.load %arg1[%c0, %c0_0] : memref<4x580xf32, #tpu.memory_space<vmem>>, vector<4x580xf32>
    %c0_1 = arith.constant 0 : index
    %c0_2 = arith.constant 0 : index
    %c0_3 = arith.constant 0 : index
    %c0_4 = arith.constant 0 : index
    %1 = vector.load %arg2[%c0_1, %c0_2, %c0_3, %c0_4] : memref<3x3x8x4xf32, #tpu.memory_space<vmem>>, vector<3x3x8x4xf32>
    %c0_5 = arith.constant 0 : index
    %c0_6 = arith.constant 0 : index
    %2 = vector.load %arg3[%c0_5, %c0_6] : memref<8x1xf32, #tpu.memory_space<vmem>>, vector<8x1xf32>
    %3 = arith.truncf %0 : vector<4x580xf32> to vector<4x580xbf16>
    %4 = arith.truncf %1 : vector<3x3x8x4xf32> to vector<3x3x8x4xbf16>
    %cst = arith.constant 0.000000e+00 : f32
    %5 = vector.broadcast %cst : f32 to vector<8x546xf32>
    %6 = vector.extract_strided_slice %4 {offsets = [0, 0, 0, 0], sizes = [1, 1, 8, 4], strides = [1, 1, 1, 1]} : vector<3x3x8x4xbf16> to vector<1x1x8x4xbf16>
    %7 = vector.shape_cast %6 : vector<1x1x8x4xbf16> to vector<8x4xbf16>
    %8 = vector.extract_strided_slice %3 {offsets = [0, 0], sizes = [4, 546], strides = [1, 1]} : vector<4x580xbf16> to vector<4x546xbf16>
    %cst_7 = arith.constant dense<0.000000e+00> : vector<8x546xf32>
    %9 = tpu.matmul %7, %8, %cst_7 {dimension_numbers = #tpu.dot_dimension_numbers<[1], [0], [0], [1], [0, 0, 1, 1], [], []>} : vector<8x4xbf16>, vector<4x546xbf16>, vector<8x546xf32> -> vector<8x546xf32>
    %10 = arith.addf %5, %9 : vector<8x546xf32>
    %11 = vector.extract_strided_slice %4 {offsets = [0, 1, 0, 0], sizes = [1, 1, 8, 4], strides = [1, 1, 1, 1]} : vector<3x3x8x4xbf16> to vector<1x1x8x4xbf16>
    %12 = vector.shape_cast %11 : vector<1x1x8x4xbf16> to vector<8x4xbf16>
    %13 = vector.extract_strided_slice %3 {offsets = [0, 1], sizes = [4, 546], strides = [1, 1]} : vector<4x580xbf16> to vector<4x546xbf16>
    %cst_8 = arith.constant dense<0.000000e+00> : vector<8x546xf32>
    %14 = tpu.matmul %12, %13, %cst_8 {dimension_numbers = #tpu.dot_dimension_numbers<[1], [0], [0], [1], [0, 0, 1, 1], [], []>} : vector<8x4xbf16>, vector<4x546xbf16>, vector<8x546xf32> -> vector<8x546xf32>
    %15 = arith.addf %10, %14 : vector<8x546xf32>
    %16 = vector.extract_strided_slice %4 {offsets = [0, 2, 0, 0], sizes = [1, 1, 8, 4], strides = [1, 1, 1, 1]} : vector<3x3x8x4xbf16> to vector<1x1x8x4xbf16>
    %17 = vector.shape_cast %16 : vector<1x1x8x4xbf16> to vector<8x4xbf16>
    %18 = vector.extract_strided_slice %3 {offsets = [0, 2], sizes = [4, 546], strides = [1, 1]} : vector<4x580xbf16> to vector<4x546xbf16>
    %cst_9 = arith.constant dense<0.000000e+00> : vector<8x546xf32>
    %19 = tpu.matmul %17, %18, %cst_9 {dimension_numbers = #tpu.dot_dimension_numbers<[1], [0], [0], [1], [0, 0, 1, 1], [], []>} : vector<8x4xbf16>, vector<4x546xbf16>, vector<8x546xf32> -> vector<8x546xf32>
    %20 = arith.addf %15, %19 : vector<8x546xf32>
    %21 = vector.extract_strided_slice %4 {offsets = [1, 0, 0, 0], sizes = [1, 1, 8, 4], strides = [1, 1, 1, 1]} : vector<3x3x8x4xbf16> to vector<1x1x8x4xbf16>
    %22 = vector.shape_cast %21 : vector<1x1x8x4xbf16> to vector<8x4xbf16>
    %23 = vector.extract_strided_slice %3 {offsets = [0, 16], sizes = [4, 546], strides = [1, 1]} : vector<4x580xbf16> to vector<4x546xbf16>
    %cst_10 = arith.constant dense<0.000000e+00> : vector<8x546xf32>
    %24 = tpu.matmul %22, %23, %cst_10 {dimension_numbers = #tpu.dot_dimension_numbers<[1], [0], [0], [1], [0, 0, 1, 1], [], []>} : vector<8x4xbf16>, vector<4x546xbf16>, vector<8x546xf32> -> vector<8x546xf32>
    %25 = arith.addf %20, %24 : vector<8x546xf32>
    %26 = vector.extract_strided_slice %4 {offsets = [1, 1, 0, 0], sizes = [1, 1, 8, 4], strides = [1, 1, 1, 1]} : vector<3x3x8x4xbf16> to vector<1x1x8x4xbf16>
    %27 = vector.shape_cast %26 : vector<1x1x8x4xbf16> to vector<8x4xbf16>
    %28 = vector.extract_strided_slice %3 {offsets = [0, 17], sizes = [4, 546], strides = [1, 1]} : vector<4x580xbf16> to vector<4x546xbf16>
    %cst_11 = arith.constant dense<0.000000e+00> : vector<8x546xf32>
    %29 = tpu.matmul %27, %28, %cst_11 {dimension_numbers = #tpu.dot_dimension_numbers<[1], [0], [0], [1], [0, 0, 1, 1], [], []>} : vector<8x4xbf16>, vector<4x546xbf16>, vector<8x546xf32> -> vector<8x546xf32>
    %30 = arith.addf %25, %29 : vector<8x546xf32>
    %31 = vector.extract_strided_slice %4 {offsets = [1, 2, 0, 0], sizes = [1, 1, 8, 4], strides = [1, 1, 1, 1]} : vector<3x3x8x4xbf16> to vector<1x1x8x4xbf16>
    %32 = vector.shape_cast %31 : vector<1x1x8x4xbf16> to vector<8x4xbf16>
    %33 = vector.extract_strided_slice %3 {offsets = [0, 18], sizes = [4, 546], strides = [1, 1]} : vector<4x580xbf16> to vector<4x546xbf16>
    %cst_12 = arith.constant dense<0.000000e+00> : vector<8x546xf32>
    %34 = tpu.matmul %32, %33, %cst_12 {dimension_numbers = #tpu.dot_dimension_numbers<[1], [0], [0], [1], [0, 0, 1, 1], [], []>} : vector<8x4xbf16>, vector<4x546xbf16>, vector<8x546xf32> -> vector<8x546xf32>
    %35 = arith.addf %30, %34 : vector<8x546xf32>
    %36 = vector.extract_strided_slice %4 {offsets = [2, 0, 0, 0], sizes = [1, 1, 8, 4], strides = [1, 1, 1, 1]} : vector<3x3x8x4xbf16> to vector<1x1x8x4xbf16>
    %37 = vector.shape_cast %36 : vector<1x1x8x4xbf16> to vector<8x4xbf16>
    %38 = vector.extract_strided_slice %3 {offsets = [0, 32], sizes = [4, 546], strides = [1, 1]} : vector<4x580xbf16> to vector<4x546xbf16>
    %cst_13 = arith.constant dense<0.000000e+00> : vector<8x546xf32>
    %39 = tpu.matmul %37, %38, %cst_13 {dimension_numbers = #tpu.dot_dimension_numbers<[1], [0], [0], [1], [0, 0, 1, 1], [], []>} : vector<8x4xbf16>, vector<4x546xbf16>, vector<8x546xf32> -> vector<8x546xf32>
    %40 = arith.addf %35, %39 : vector<8x546xf32>
    %41 = vector.extract_strided_slice %4 {offsets = [2, 1, 0, 0], sizes = [1, 1, 8, 4], strides = [1, 1, 1, 1]} : vector<3x3x8x4xbf16> to vector<1x1x8x4xbf16>
    %42 = vector.shape_cast %41 : vector<1x1x8x4xbf16> to vector<8x4xbf16>
    %43 = vector.extract_strided_slice %3 {offsets = [0, 33], sizes = [4, 546], strides = [1, 1]} : vector<4x580xbf16> to vector<4x546xbf16>
    %cst_14 = arith.constant dense<0.000000e+00> : vector<8x546xf32>
    %44 = tpu.matmul %42, %43, %cst_14 {dimension_numbers = #tpu.dot_dimension_numbers<[1], [0], [0], [1], [0, 0, 1, 1], [], []>} : vector<8x4xbf16>, vector<4x546xbf16>, vector<8x546xf32> -> vector<8x546xf32>
    %45 = arith.addf %40, %44 : vector<8x546xf32>
    %46 = vector.extract_strided_slice %4 {offsets = [2, 2, 0, 0], sizes = [1, 1, 8, 4], strides = [1, 1, 1, 1]} : vector<3x3x8x4xbf16> to vector<1x1x8x4xbf16>
    %47 = vector.shape_cast %46 : vector<1x1x8x4xbf16> to vector<8x4xbf16>
    %48 = vector.extract_strided_slice %3 {offsets = [0, 34], sizes = [4, 546], strides = [1, 1]} : vector<4x580xbf16> to vector<4x546xbf16>
    %cst_15 = arith.constant dense<0.000000e+00> : vector<8x546xf32>
    %49 = tpu.matmul %47, %48, %cst_15 {dimension_numbers = #tpu.dot_dimension_numbers<[1], [0], [0], [1], [0, 0, 1, 1], [], []>} : vector<8x4xbf16>, vector<4x546xbf16>, vector<8x546xf32> -> vector<8x546xf32>
    %50 = arith.addf %45, %49 : vector<8x546xf32>
    %51 = vector.broadcast %2 : vector<8x1xf32> to vector<8x546xf32>
    %52 = arith.addf %50, %51 : vector<8x546xf32>
    %cst_16 = arith.constant 0.000000e+00 : f32
    %53 = vector.broadcast %cst_16 : f32 to vector<8x546xf32>
    %54 = arith.maximumf %52, %53 : vector<8x546xf32>
    %c0_17 = arith.constant 0 : index
    %c0_18 = arith.constant 0 : index
    %c0_19 = arith.constant 0 : index
    %c0_20 = arith.constant 0 : index
    %55 = vector.load %arg4[%c0_17, %c0_18, %c0_19, %c0_20] : memref<3x3x8x8xf32, #tpu.memory_space<vmem>>, vector<3x3x8x8xf32>
    %c0_21 = arith.constant 0 : index
    %c0_22 = arith.constant 0 : index
    %56 = vector.load %arg5[%c0_21, %c0_22] : memref<8x1xf32, #tpu.memory_space<vmem>>, vector<8x1xf32>
    %57 = arith.truncf %54 : vector<8x546xf32> to vector<8x546xbf16>
    %58 = arith.truncf %55 : vector<3x3x8x8xf32> to vector<3x3x8x8xbf16>
    %cst_23 = arith.constant 0.000000e+00 : f32
    %59 = vector.broadcast %cst_23 : f32 to vector<8x512xf32>
    %60 = vector.extract_strided_slice %58 {offsets = [0, 0, 0, 0], sizes = [1, 1, 8, 8], strides = [1, 1, 1, 1]} : vector<3x3x8x8xbf16> to vector<1x1x8x8xbf16>
    %61 = vector.shape_cast %60 : vector<1x1x8x8xbf16> to vector<8x8xbf16>
    %62 = vector.extract_strided_slice %57 {offsets = [0, 0], sizes = [8, 512], strides = [1, 1]} : vector<8x546xbf16> to vector<8x512xbf16>
    %cst_24 = arith.constant dense<0.000000e+00> : vector<8x512xf32>
    %63 = tpu.matmul %61, %62, %cst_24 {dimension_numbers = #tpu.dot_dimension_numbers<[1], [0], [0], [1], [0, 0, 1, 1], [], []>} : vector<8x8xbf16>, vector<8x512xbf16>, vector<8x512xf32> -> vector<8x512xf32>
    %64 = arith.addf %59, %63 : vector<8x512xf32>
    %65 = vector.extract_strided_slice %58 {offsets = [0, 1, 0, 0], sizes = [1, 1, 8, 8], strides = [1, 1, 1, 1]} : vector<3x3x8x8xbf16> to vector<1x1x8x8xbf16>
    %66 = vector.shape_cast %65 : vector<1x1x8x8xbf16> to vector<8x8xbf16>
    %67 = vector.extract_strided_slice %57 {offsets = [0, 1], sizes = [8, 512], strides = [1, 1]} : vector<8x546xbf16> to vector<8x512xbf16>
    %cst_25 = arith.constant dense<0.000000e+00> : vector<8x512xf32>
    %68 = tpu.matmul %66, %67, %cst_25 {dimension_numbers = #tpu.dot_dimension_numbers<[1], [0], [0], [1], [0, 0, 1, 1], [], []>} : vector<8x8xbf16>, vector<8x512xbf16>, vector<8x512xf32> -> vector<8x512xf32>
    %69 = arith.addf %64, %68 : vector<8x512xf32>
    %70 = vector.extract_strided_slice %58 {offsets = [0, 2, 0, 0], sizes = [1, 1, 8, 8], strides = [1, 1, 1, 1]} : vector<3x3x8x8xbf16> to vector<1x1x8x8xbf16>
    %71 = vector.shape_cast %70 : vector<1x1x8x8xbf16> to vector<8x8xbf16>
    %72 = vector.extract_strided_slice %57 {offsets = [0, 2], sizes = [8, 512], strides = [1, 1]} : vector<8x546xbf16> to vector<8x512xbf16>
    %cst_26 = arith.constant dense<0.000000e+00> : vector<8x512xf32>
    %73 = tpu.matmul %71, %72, %cst_26 {dimension_numbers = #tpu.dot_dimension_numbers<[1], [0], [0], [1], [0, 0, 1, 1], [], []>} : vector<8x8xbf16>, vector<8x512xbf16>, vector<8x512xf32> -> vector<8x512xf32>
    %74 = arith.addf %69, %73 : vector<8x512xf32>
    %75 = vector.extract_strided_slice %58 {offsets = [1, 0, 0, 0], sizes = [1, 1, 8, 8], strides = [1, 1, 1, 1]} : vector<3x3x8x8xbf16> to vector<1x1x8x8xbf16>
    %76 = vector.shape_cast %75 : vector<1x1x8x8xbf16> to vector<8x8xbf16>
    %77 = vector.extract_strided_slice %57 {offsets = [0, 16], sizes = [8, 512], strides = [1, 1]} : vector<8x546xbf16> to vector<8x512xbf16>
    %cst_27 = arith.constant dense<0.000000e+00> : vector<8x512xf32>
    %78 = tpu.matmul %76, %77, %cst_27 {dimension_numbers = #tpu.dot_dimension_numbers<[1], [0], [0], [1], [0, 0, 1, 1], [], []>} : vector<8x8xbf16>, vector<8x512xbf16>, vector<8x512xf32> -> vector<8x512xf32>
    %79 = arith.addf %74, %78 : vector<8x512xf32>
    %80 = vector.extract_strided_slice %58 {offsets = [1, 1, 0, 0], sizes = [1, 1, 8, 8], strides = [1, 1, 1, 1]} : vector<3x3x8x8xbf16> to vector<1x1x8x8xbf16>
    %81 = vector.shape_cast %80 : vector<1x1x8x8xbf16> to vector<8x8xbf16>
    %82 = vector.extract_strided_slice %57 {offsets = [0, 17], sizes = [8, 512], strides = [1, 1]} : vector<8x546xbf16> to vector<8x512xbf16>
    %cst_28 = arith.constant dense<0.000000e+00> : vector<8x512xf32>
    %83 = tpu.matmul %81, %82, %cst_28 {dimension_numbers = #tpu.dot_dimension_numbers<[1], [0], [0], [1], [0, 0, 1, 1], [], []>} : vector<8x8xbf16>, vector<8x512xbf16>, vector<8x512xf32> -> vector<8x512xf32>
    %84 = arith.addf %79, %83 : vector<8x512xf32>
    %85 = vector.extract_strided_slice %58 {offsets = [1, 2, 0, 0], sizes = [1, 1, 8, 8], strides = [1, 1, 1, 1]} : vector<3x3x8x8xbf16> to vector<1x1x8x8xbf16>
    %86 = vector.shape_cast %85 : vector<1x1x8x8xbf16> to vector<8x8xbf16>
    %87 = vector.extract_strided_slice %57 {offsets = [0, 18], sizes = [8, 512], strides = [1, 1]} : vector<8x546xbf16> to vector<8x512xbf16>
    %cst_29 = arith.constant dense<0.000000e+00> : vector<8x512xf32>
    %88 = tpu.matmul %86, %87, %cst_29 {dimension_numbers = #tpu.dot_dimension_numbers<[1], [0], [0], [1], [0, 0, 1, 1], [], []>} : vector<8x8xbf16>, vector<8x512xbf16>, vector<8x512xf32> -> vector<8x512xf32>
    %89 = arith.addf %84, %88 : vector<8x512xf32>
    %90 = vector.extract_strided_slice %58 {offsets = [2, 0, 0, 0], sizes = [1, 1, 8, 8], strides = [1, 1, 1, 1]} : vector<3x3x8x8xbf16> to vector<1x1x8x8xbf16>
    %91 = vector.shape_cast %90 : vector<1x1x8x8xbf16> to vector<8x8xbf16>
    %92 = vector.extract_strided_slice %57 {offsets = [0, 32], sizes = [8, 512], strides = [1, 1]} : vector<8x546xbf16> to vector<8x512xbf16>
    %cst_30 = arith.constant dense<0.000000e+00> : vector<8x512xf32>
    %93 = tpu.matmul %91, %92, %cst_30 {dimension_numbers = #tpu.dot_dimension_numbers<[1], [0], [0], [1], [0, 0, 1, 1], [], []>} : vector<8x8xbf16>, vector<8x512xbf16>, vector<8x512xf32> -> vector<8x512xf32>
    %94 = arith.addf %89, %93 : vector<8x512xf32>
    %95 = vector.extract_strided_slice %58 {offsets = [2, 1, 0, 0], sizes = [1, 1, 8, 8], strides = [1, 1, 1, 1]} : vector<3x3x8x8xbf16> to vector<1x1x8x8xbf16>
    %96 = vector.shape_cast %95 : vector<1x1x8x8xbf16> to vector<8x8xbf16>
    %97 = vector.extract_strided_slice %57 {offsets = [0, 33], sizes = [8, 512], strides = [1, 1]} : vector<8x546xbf16> to vector<8x512xbf16>
    %cst_31 = arith.constant dense<0.000000e+00> : vector<8x512xf32>
    %98 = tpu.matmul %96, %97, %cst_31 {dimension_numbers = #tpu.dot_dimension_numbers<[1], [0], [0], [1], [0, 0, 1, 1], [], []>} : vector<8x8xbf16>, vector<8x512xbf16>, vector<8x512xf32> -> vector<8x512xf32>
    %99 = arith.addf %94, %98 : vector<8x512xf32>
    %100 = vector.extract_strided_slice %58 {offsets = [2, 2, 0, 0], sizes = [1, 1, 8, 8], strides = [1, 1, 1, 1]} : vector<3x3x8x8xbf16> to vector<1x1x8x8xbf16>
    %101 = vector.shape_cast %100 : vector<1x1x8x8xbf16> to vector<8x8xbf16>
    %102 = vector.extract_strided_slice %57 {offsets = [0, 34], sizes = [8, 512], strides = [1, 1]} : vector<8x546xbf16> to vector<8x512xbf16>
    %cst_32 = arith.constant dense<0.000000e+00> : vector<8x512xf32>
    %103 = tpu.matmul %101, %102, %cst_32 {dimension_numbers = #tpu.dot_dimension_numbers<[1], [0], [0], [1], [0, 0, 1, 1], [], []>} : vector<8x8xbf16>, vector<8x512xbf16>, vector<8x512xf32> -> vector<8x512xf32>
    %104 = arith.addf %99, %103 : vector<8x512xf32>
    %105 = vector.broadcast %56 : vector<8x1xf32> to vector<8x512xf32>
    %106 = arith.addf %104, %105 : vector<8x512xf32>
    %cst_33 = arith.constant 0.000000e+00 : f32
    %107 = vector.broadcast %cst_33 : f32 to vector<8x512xf32>
    %108 = arith.maximumf %106, %107 : vector<8x512xf32>
    %c0_34 = arith.constant 0 : index
    %c0_35 = arith.constant 0 : index
    %109 = vector.load %arg6[%c0_34, %c0_35] : memref<8x512xf32, #tpu.memory_space<vmem>>, vector<8x512xf32>
    tpu.vector_store %arg6[%c0_34, %c0_35], %108 {strides = array<i32>} : memref<8x512xf32, #tpu.memory_space<vmem>>, vector<8x512xf32>,
    return
  }
  func.func @transform_0(%arg0: i32) -> (i32, i32) {
    %c0_i32 = arith.constant 0 : i32
    %c0_i32_0 = arith.constant 0 : i32
    %c0_i32_1 = arith.constant 0 : i32
    return %c0_i32, %c0_i32_0 : i32, i32
  }
  func.func @transform_1(%arg0: i32) -> (i32, i32, i32, i32) {
    %c0_i32 = arith.constant 0 : i32
    %c0_i32_0 = arith.constant 0 : i32
    %c0_i32_1 = arith.constant 0 : i32
    %c0_i32_2 = arith.constant 0 : i32
    %c0_i32_3 = arith.constant 0 : i32
    return %c0_i32, %c0_i32_0, %c0_i32_1, %c0_i32_2 : i32, i32, i32, i32
  }
  func.func @transform_2(%arg0: i32) -> (i32, i32) {
    %c0_i32 = arith.constant 0 : i32
    %c0_i32_0 = arith.constant 0 : i32
    %c0_i32_1 = arith.constant 0 : i32
    return %c0_i32, %c0_i32_0 : i32, i32
  }
  func.func @transform_3(%arg0: i32) -> (i32, i32, i32, i32) {
    %c0_i32 = arith.constant 0 : i32
    %c0_i32_0 = arith.constant 0 : i32
    %c0_i32_1 = arith.constant 0 : i32
    %c0_i32_2 = arith.constant 0 : i32
    %c0_i32_3 = arith.constant 0 : i32
    return %c0_i32, %c0_i32_0, %c0_i32_1, %c0_i32_2 : i32, i32, i32, i32
  }
  func.func @transform_4(%arg0: i32) -> (i32, i32) {
    %c0_i32 = arith.constant 0 : i32
    %c0_i32_0 = arith.constant 0 : i32
    %c0_i32_1 = arith.constant 0 : i32
    return %c0_i32, %c0_i32_0 : i32, i32
  }
  func.func @transform_5(%arg0: i32) -> (i32, i32) {
    %c0_i32 = arith.constant 0 : i32
    %c0_i32_0 = arith.constant 0 : i32
    %c0_i32_1 = arith.constant 0 : i32
    return %c0_i32, %c0_i32_0 : i32, i32
  }
}

</mosaic_0001>

<bundles_post_ra>
// kernel: tpu_custom_call.1
= control target key start
LH: loop header
LB: loop body
LE: loop exit
PB: predicated region body
PF: predicated region fallthrough
CT: control target
= control target key end

     0   :  { %s2438_s0 = inlined_call_operand.vmem [shape: f32[4,580], index: 0, kind: input, shape index: {}]   ;;  %s2439_s1 = inlined_call_operand.vmem [shape: f32[3,3,8,4], index: 1, kind: input, shape index: {}]   ;;  %s2440_s2 = inlined_call_operand.vmem [shape: f32[8,1], index: 2, kind: input, shape index: {}]   ;;  %s2441_s3 = inlined_call_operand.vmem [shape: f32[3,3,8,8], index: 3, kind: input, shape index: {}]   ;;  %s2442_s4 = inlined_call_operand.vmem [shape: f32[8,1], index: 4, kind: input, shape index: {}]   ;;  %s2443_s5 = inlined_call_operand.hbm [shape: f32[8,512], index: 5, kind: output, shape index: {}]  }
   0x1   :  { %v23_v0 = vld [vmem:[%s2438_s0 + $0x8] sm:$0xff]  ;;  %v22_v1 = vld [vmem:[%s2438_s0] sm:$0xff]  ;;  %v24_v2 = vld [vmem:[%s2438_s0 + $0x10] sm:$0xf] }
   0x2   :  { %40 = vst [vmem:[#allocation1 + $0x10] ss:$2 sm:$0xff] %v23_v0 }
   0x3   :  { %10 = vsyncpa [#allocation3], 0  ;;  %38 = vst [vmem:[#allocation1] ss:$2 sm:$0xff] %v22_v1  ;;  %s1929_s0 = smov 127   ;;  %s1930_s24 = smov 126  }
   0x4   :  { %42 = vst [vmem:[#allocation1 + $0x20] ss:$2 sm:$0xff] %v24_v2  ;;  %s1931_s25 = smov 112   ;;  %s1932_s26 = smov 111   ;;  %vm97_vm0 = vcmask 1041408   ;;  %vm88_vm1 = vcmask 1039360  }
   0x5   :  { %s1933_s27 = smov 110   ;;  %s1934_s28 = smov 96   ;;  %v26_v25 = vld [vmem:[%s2439_s1 + $0x8] sm:$0xff]  ;;  %vm93_vm2 = vcmask 31744   ;;  %vm271_vm3 = vcmask 1031168   ;;  %v25_v50 = vld [vmem:[%s2439_s1] sm:$0xff] }
   0x6   :  { %s1935_s29 = smov 95   ;;  %s1936_s30 = smov 94   ;;  %v57_v31 = vpack.c.bf16 %v26_v25, %v26_v25  ;;  %vm374_vm4 = vcmask 916480   ;;  %v56_v53 = vpack.c.bf16 %v25_v50, %v25_v50  ;;  %v27_v63 = vld [vmem:[%s2439_s1 + $0x10] sm:$0xff]  ;;  %vm477_vm5 = vcmask 908288   ;;  %v30_v50 = vld [vmem:[%s2439_s1 + $0x28] sm:$0xff] }
   0x7   :  { %v58_v2 = vpack.c.bf16 %v27_v63, %v27_v63  ;;  %vm580_vm6 = vcmask 900096   ;;  %vm683_vm7 = vcmask 785408   ;;  %vm786_vm8 = vcmask 777216   ;;  %v31_v63 = vld [vmem:[%s2439_s1 + $0x30] sm:$0xff]  ;;  %s1801_s20 = sshll.u32 %s2443_s5, 4  ;;  %s1802_s20 = int_to_ptr.hbm [resolvable:$true] %s1801_s20 }
   0x8   :  { %vm889_vm9 = vcmask 769024   ;;  %vm1050_vm10 = vcmask 1043456   ;;  %vm1046_vm11 = vcmask 64512  }
   0x9   :  { %v45_v3 = vld.sshfl [vmem:[#allocation1 + $0x10] sm:$0xff pattern:$0x75316420]  ;;  %v46_v4 = vld.sshfl [vmem:[#allocation1 + $0x18] sm:$0xff pattern:$0x75316420] }
   0xa   :  { %v54_v5 = vpack.c.bf16 %v46_v4, %v45_v3  ;;  %v43_v6 = vld.sshfl [vmem:[#allocation1] sm:$0xff pattern:$0x75316420]  ;;  %v44_v7 = vld.sshfl [vmem:[#allocation1 + $0x8] sm:$0xff pattern:$0x75316420] }
   0xb   :  { %v53_v8 = vpack.c.bf16 %v44_v7, %v43_v6  ;;  %v47_v9 = vld.sshfl [vmem:[#allocation1 + $0x20] sm:$0xff pattern:$0x75316420] }
   0xc   :  { %v70_v10 = vunpack.c.l.b16 %v54_v5  ;;  %v55_v11 = vpack.c.bf16 %v47_v9, %v47_v9  ;;  %v71_v16 = vunpack.c.h.b16 %v54_v5 }
   0xd   :  { %v68_v12 = vunpack.c.l.b16 %v53_v8  ;;  %v69_v18 = vunpack.c.h.b16 %v53_v8 }
   0xe   :  { %v1978_v13 = vpack.c.b16 %v70_v10, %v70_v10  ;;  %v72_v14 = vunpack.c.l.b16 %v55_v11  ;;  %v1990_v19 = vpack.c.b16 %v71_v16, %v71_v16 }
   0xf   :  { %v1980_v15 = vpack.c.b16 %v68_v12, %v68_v12  ;;  %v1992_v20 = vpack.c.b16 %v69_v18, %v69_v18  ;;  %v28_v12 = vld [vmem:[%s2439_s1 + $0x18] sm:$0xff] }
  0x10   :  { %82 = vrot.lane.b32.xlu1 %v1978_v13, %s1929_s0  ;;  %v1984_v17 = vpack.c.b16 %v72_v14, %v72_v14  ;;  %v188_v40 = vsel %vm97_vm0, %v1978_v13, 0  ;;  %v191_v42 = vsel %vm97_vm0, %v1990_v19, 0  ;;  %v59_v16 = vpack.c.bf16 %v28_v12, %v28_v12  ;;  %v32_v12 = vld [vmem:[%s2439_s1 + $0x38] sm:$0xff] }
  0x11   :  { %78 = vrot.lane.b32.xlu0 %v1980_v15, %s1929_s0  ;;  %v182_v32 = vsel %vm97_vm0, %v1980_v15, 0  ;;  %v185_v39 = vsel %vm97_vm0, %v1992_v20, 0 }
  0x12   :  { %86 = vrot.lane.b32.xlu2 %v1984_v17, %s1929_s0  ;;  %v194_v43 = vsel %vm97_vm0, %v1984_v17, 0 }
  0x18   :  { %84 = vrot.lane.b32.xlu1 %v1990_v19, %s1929_s0 }
  0x19   :  { %80 = vrot.lane.b32.xlu0 %v1992_v20, %s1929_s0 }
  0x1a   :  { %261 = vrot.lane.b32.xlu2 %v1980_v15, %s1930_s24 }
  0x20   :  { %265 = vrot.lane.b32.xlu1 %v1978_v13, %s1930_s24 }
  0x21   :  { %263 = vrot.lane.b32.xlu0 %v1992_v20, %s1930_s24 }
  0x22   :  { %267 = vrot.lane.b32.xlu2 %v1990_v19, %s1930_s24 }
  0x28   :  { %366 = vrot.lane.b32.xlu1 %v1992_v20, %s1931_s25 }
  0x29   :  { %364 = vrot.lane.b32.xlu0 %v1980_v15, %s1931_s25 }
  0x2a   :  { %269 = vrot.lane.b32.xlu2 %v1984_v17, %s1930_s24 }
  0x30   :  { %370 = vrot.lane.b32.xlu1 %v1990_v19, %s1931_s25 }
  0x31   :  { %368 = vrot.lane.b32.xlu0 %v1978_v13, %s1931_s25 }
  0x32   :  { %372 = vrot.lane.b32.xlu2 %v1984_v17, %s1931_s25 }
  0x38   :  { %469 = vrot.lane.b32.xlu1 %v1992_v20, %s1932_s26 }
  0x39   :  { %467 = vrot.lane.b32.xlu0 %v1980_v15, %s1932_s26 }
  0x3a   :  { %471 = vrot.lane.b32.xlu2 %v1978_v13, %s1932_s26 }
  0x40   :  { %475 = vrot.lane.b32.xlu1 %v1984_v17, %s1932_s26 }
  0x41   :  { %473 = vrot.lane.b32.xlu0 %v1990_v19, %s1932_s26 }
  0x42   :  { %572 = vrot.lane.b32.xlu2 %v1992_v20, %s1933_s27 }
  0x48   :  { %576 = vrot.lane.b32.xlu1 %v1990_v19, %s1933_s27 }
  0x49   :  { %574 = vrot.lane.b32.xlu0 %v1978_v13, %s1933_s27 }
  0x4a   :  { %570 = vrot.lane.b32.xlu2 %v1980_v15, %s1933_s27 }
  0x50   :  { %673 = vrot.lane.b32.xlu1 %v1980_v15, %s1934_s28 }
  0x51   :  { %578 = vrot.lane.b32.xlu0 %v1984_v17, %s1933_s27 }
  0x52   :  { %675 = vrot.lane.b32.xlu2 %v1992_v20, %s1934_s28 }
  0x58   :  { %679 = vrot.lane.b32.xlu1 %v1990_v19, %s1934_s28 }
  0x59   :  { %677 = vrot.lane.b32.xlu0 %v1978_v13, %s1934_s28 }
  0x5a   :  { %776 = vrot.lane.b32.xlu2 %v1980_v15, %s1935_s29 }
  0x60   :  { %681 = vrot.lane.b32.xlu1 %v1984_v17, %s1934_s28 }
  0x61   :  { %778 = vrot.lane.b32.xlu0 %v1992_v20, %s1935_s29 }
  0x62   :  { %780 = vrot.lane.b32.xlu2 %v1978_v13, %s1935_s29 }
  0x68   :  { %784 = vrot.lane.b32.xlu1 %v1984_v17, %s1935_s29 }
  0x69   :  { %782 = vrot.lane.b32.xlu0 %v1990_v19, %s1935_s29 }
  0x6a   :  { %879 = vrot.lane.b32.xlu2 %v1980_v15, %s1936_s30 }
  0x6c   :  { %v87_v21 = vpop.permute.xlu2 %86 }
  0x6d   :  { %v111_v27 = vsel %vm97_vm0, %v87_v21, 0 }
  0x70   :  { %883 = vrot.lane.b32.xlu1 %v1978_v13, %s1936_s30 }
  0x71   :  { %881 = vrot.lane.b32.xlu0 %v1992_v20, %s1936_s30 }
  0x72   :  { %885 = vrot.lane.b32.xlu2 %v1990_v19, %s1936_s30 }
  0x74   :  { %v262_v24 = vpop.permute.xlu2 %261 }
  0x79   :  { %887 = vrot.lane.b32.xlu0 %v1984_v17, %s1936_s30 }
  0x7c   :  { %v268_v41 = vpop.permute.xlu2 %267 }
  0x82   :  { %v83_v22 = vpop.permute.xlu1 %82 }
  0x83   :  { %v79_v23 = vpop.permute.xlu0 %78 }
  0x84   :  { %v270_v51 = vpop.permute.xlu2 %269 }
  0x85   :  { %v275_v56 = vsel %vm271_vm3, %v268_v41, %v270_v51  ;;  %v292_v60 = vsel %vm97_vm0, %v270_v51, 0 }
  0x86   :  { %v289_v59 = vsel %vm97_vm0, %v275_v56, 0 }
  0x8a   :  { %v85_v26 = vpop.permute.xlu1 %84 }
  0x8b   :  { %v81_v28 = vpop.permute.xlu0 %80  ;;  %v91_v29 = vsel %vm88_vm1, %v83_v22, %v85_v26  ;;  %v92_v30 = vsel %vm88_vm1, %v85_v26, %v87_v21 }
  0x8c   :  { %v89_v33 = vsel %vm88_vm1, %v79_v23, %v81_v28  ;;  %v90_v34 = vsel %vm88_vm1, %v81_v28, %v83_v22  ;;  %v105_v35 = vsel %vm97_vm0, %v91_v29, 0  ;;  %v108_v36 = vsel %vm97_vm0, %v92_v30, 0  ;;  %v373_v1 = vpop.permute.xlu2 %372 }
  0x8d   :  { %v99_v37 = vsel %vm97_vm0, %v89_v33, 0  ;;  %v102_v38 = vsel %vm97_vm0, %v90_v34, 0  ;;  %146 = vmatpush.bf16.msra.mxu2 %v105_v35  ;;  %159 = vmatpush.bf16.msra.mxu3 %v108_v36  ;;  %v395_v9 = vsel %vm97_vm0, %v373_v1, 0 }
  0x8e   :  { %120 = vmatpush.bf16.msra.mxu0 %v99_v37  ;;  %133 = vmatpush.bf16.msra.mxu1 %v102_v38  ;;  %v29_v38 = vld [vmem:[%s2439_s1 + $0x20] sm:$0xff] }
  0x90   :  { %1812 = vmatmul.msk.bf16.vlgmr.msra.gmra.mxu2 %vm93_vm2, %v57_v31  ;;  %1813 = vmatmul.msk.bf16.vlgmr.msra.gmra.mxu3 %vm93_vm2, %v57_v31 }
  0x91   :  { %1810 = vmatmul.msk.bf16.vlgmr.msra.gmra.mxu0 %vm93_vm2, %v57_v31  ;;  %1811 = vmatmul.msk.bf16.vlgmr.msra.gmra.mxu1 %vm93_vm2, %v57_v31 }
  0x92   :  { %172 = vmatpush.bf16.msrb.mxu0 %v111_v27  ;;  %203 = vmatpush.bf16.msrb.mxu1 %v182_v32  ;;  %v266_v44 = vpop.permute.xlu1 %265 }
  0x93   :  { %216 = vmatpush.bf16.msrb.mxu2 %v185_v39  ;;  %229 = vmatpush.bf16.msrb.mxu3 %v188_v40  ;;  %v264_v45 = vpop.permute.xlu0 %263  ;;  %v274_v54 = vsel %vm271_vm3, %v266_v44, %v268_v41  ;;  %v60_v41 = vpack.c.bf16 %v29_v38, %v29_v38 }
  0x94   :  { %v272_v46 = vsel %vm271_vm3, %v262_v24, %v264_v45  ;;  %v273_v47 = vsel %vm271_vm3, %v264_v45, %v266_v44  ;;  %v286_v58 = vsel %vm97_vm0, %v274_v54, 0  ;;  %v472_v13 = vpop.permute.xlu2 %471 }
  0x95   :  { %v280_v48 = vsel %vm97_vm0, %v272_v46, 0  ;;  %v283_v49 = vsel %vm97_vm0, %v273_v47, 0 }
  0x96   :  { %242 = vmatpush.bf16.msra.mxu0 %v191_v42  ;;  %255 = vmatpush.bf16.msra.mxu1 %v194_v43 }
  0x97   :  { %301 = vmatpush.bf16.msra.mxu2 %v280_v48  ;;  %314 = vmatpush.bf16.msra.mxu3 %v283_v49 }
  0x9a   :  { %v367_v52 = vpop.permute.xlu1 %366 }
  0x9b   :  { %v365_v55 = vpop.permute.xlu0 %364 }
  0x9c   :  { %v375_v57 = vsel %vm374_vm4, %v365_v55, %v367_v52  ;;  %v573_v25 = vpop.permute.xlu2 %572 }
  0x9d   :  { %v383_v61 = vsel %vm97_vm0, %v375_v57, 0 }
  0xa0   :  { %1816 = vmatmul.msk.bf16.vlgmr.msrb.gmra.mxu2 %vm93_vm2, %v56_v53  ;;  %1817 = vmatmul.msk.bf16.vlgmr.msrb.gmra.mxu3 %vm93_vm2, %v56_v53 }
  0xa1   :  { %1814 = vmatmul.msk.bf16.vlgmr.msrb.gmra.mxu0 %vm93_vm2, %v57_v31  ;;  %1815 = vmatmul.msk.bf16.vlgmr.msrb.gmra.mxu1 %vm93_vm2, %v56_v53 }
  0xa2   :  { %327 = vmatpush.bf16.msrb.mxu0 %v286_v58  ;;  %340 = vmatpush.bf16.msrb.mxu1 %v289_v59  ;;  %v371_v62 = vpop.permute.xlu1 %370 }
  0xa3   :  { %353 = vmatpush.bf16.msrb.mxu2 %v292_v60  ;;  %404 = vmatpush.bf16.msrb.mxu3 %v383_v61  ;;  %v369_v0 = vpop.permute.xlu0 %368  ;;  %v378_v5 = vsel %vm374_vm4, %v371_v62, %v373_v1 }
  0xa4   :  { %v376_v3 = vsel %vm374_vm4, %v367_v52, %v369_v0  ;;  %v377_v4 = vsel %vm374_vm4, %v369_v0, %v371_v62  ;;  %v392_v8 = vsel %vm97_vm0, %v378_v5, 0  ;;  %v571_v27 = vpop.permute.xlu2 %570 }
  0xa5   :  { %v386_v6 = vsel %vm97_vm0, %v376_v3, 0  ;;  %v389_v7 = vsel %vm97_vm0, %v377_v4, 0  ;;  %v581_v29 = vsel %vm580_vm6, %v571_v27, %v573_v25 }
  0xa6   :  { %v589_v33 = vsel %vm97_vm0, %v581_v29, 0 }
  0xaa   :  { %v470_v10 = vpop.permute.xlu1 %469 }
  0xab   :  { %v468_v11 = vpop.permute.xlu0 %467  ;;  %v479_v18 = vsel %vm477_vm5, %v470_v10, %v472_v13 }
  0xac   :  { %v478_v17 = vsel %vm477_vm5, %v468_v11, %v470_v10  ;;  %v489_v22 = vsel %vm97_vm0, %v479_v18, 0  ;;  %v676_v39 = vpop.permute.xlu2 %675 }
  0xad   :  { %v486_v21 = vsel %vm97_vm0, %v478_v17, 0 }
  0xb0   :  { %1820 = vmatmul.msk.bf16.vlgmr.msra.gmra.mxu2 %vm93_vm2, %v58_v2  ;;  %1821 = vmatmul.msk.bf16.vlgmr.msra.gmra.mxu3 %vm93_vm2, %v58_v2 }
  0xb1   :  { %1818 = vmatmul.msk.bf16.vlgmr.msra.gmra.mxu0 %vm93_vm2, %v56_v53  ;;  %1819 = vmatmul.msk.bf16.vlgmr.msra.gmra.mxu1 %vm93_vm2, %v56_v53  ;;  %v61_v53 = vpack.c.bf16 %v30_v50, %v30_v50 }
  0xb2   :  { %417 = vmatpush.bf16.msra.mxu0 %v386_v6  ;;  %430 = vmatpush.bf16.msra.mxu1 %v389_v7  ;;  %v476_v14 = vpop.permute.xlu1 %475 }
  0xb3   :  { %443 = vmatpush.bf16.msra.mxu2 %v392_v8  ;;  %456 = vmatpush.bf16.msra.mxu3 %v395_v9  ;;  %v474_v15 = vpop.permute.xlu0 %473  ;;  %v498_v32 = vsel %vm97_vm0, %v476_v14, 0 }
  0xb4   :  { %v480_v19 = vsel %vm477_vm5, %v472_v13, %v474_v15  ;;  %v481_v20 = vsel %vm477_vm5, %v474_v15, %v476_v14  ;;  %v777_v55 = vpop.permute.xlu2 %776 }
  0xb5   :  { %v492_v23 = vsel %vm97_vm0, %v480_v19, 0  ;;  %v495_v24 = vsel %vm97_vm0, %v481_v20, 0 }
  0xba   :  { %v577_v28 = vpop.permute.xlu1 %576 }
  0xbb   :  { %v575_v26 = vpop.permute.xlu0 %574 }
  0xbc   :  { %v582_v30 = vsel %vm580_vm6, %v573_v25, %v575_v26  ;;  %v583_v31 = vsel %vm580_vm6, %v575_v26, %v577_v28  ;;  %v781_v0 = vpop.permute.xlu2 %780 }
  0xbd   :  { %v592_v34 = vsel %vm97_vm0, %v582_v30, 0  ;;  %v595_v35 = vsel %vm97_vm0, %v583_v31, 0 }
  0xc0   :  { %1824 = vmatmul.msk.bf16.vlgmr.msrb.gmra.mxu2 %vm93_vm2, %v58_v2  ;;  %1825 = vmatmul.msk.bf16.vlgmr.msrb.gmra.mxu3 %vm93_vm2, %v59_v16 }
  0xc1   :  { %1822 = vmatmul.msk.bf16.vlgmr.msrb.gmra.mxu0 %vm93_vm2, %v58_v2  ;;  %1823 = vmatmul.msk.bf16.vlgmr.msrb.gmra.mxu1 %vm93_vm2, %v58_v2  ;;  %v62_v2 = vpack.c.bf16 %v31_v63, %v31_v63 }
  0xc2   :  { %507 = vmatpush.bf16.msrb.mxu0 %v486_v21  ;;  %520 = vmatpush.bf16.msrb.mxu1 %v489_v22  ;;  %v674_v37 = vpop.permute.xlu1 %673 }
  0xc3   :  { %533 = vmatpush.bf16.msrb.mxu2 %v492_v23  ;;  %546 = vmatpush.bf16.msrb.mxu3 %v495_v24  ;;  %v579_v36 = vpop.permute.xlu0 %578  ;;  %v684_v43 = vsel %vm683_vm7, %v674_v37, %v676_v39 }
  0xc4   :  { %v584_v42 = vsel %vm580_vm6, %v577_v28, %v579_v36  ;;  %v601_v46 = vsel %vm97_vm0, %v579_v36, 0  ;;  %v692_v48 = vsel %vm97_vm0, %v684_v43, 0  ;;  %v880_v10 = vpop.permute.xlu2 %879 }
  0xc5   :  { %v598_v45 = vsel %vm97_vm0, %v584_v42, 0 }
  0xca   :  { %v680_v47 = vpop.permute.xlu1 %679 }
  0xcb   :  { %v678_v40 = vpop.permute.xlu0 %677 }
  0xcc   :  { %v685_v44 = vsel %vm683_vm7, %v676_v39, %v678_v40  ;;  %v686_v54 = vsel %vm683_vm7, %v678_v40, %v680_v47  ;;  %v886_v14 = vpop.permute.xlu2 %885 }
  0xcd   :  { %v695_v49 = vsel %vm97_vm0, %v685_v44, 0  ;;  %v698_v58 = vsel %vm97_vm0, %v686_v54, 0 }
  0xd0   :  { %1828 = vmatmul.msk.bf16.vlgmr.msra.gmra.mxu2 %vm93_vm2, %v59_v16  ;;  %1829 = vmatmul.msk.bf16.vlgmr.msra.gmra.mxu3 %vm93_vm2, %v59_v16 }
  0xd1   :  { %1826 = vmatmul.msk.bf16.vlgmr.msra.gmra.mxu0 %vm93_vm2, %v59_v16  ;;  %1827 = vmatmul.msk.bf16.vlgmr.msra.gmra.mxu1 %vm93_vm2, %v59_v16  ;;  %v63_v16 = vpack.c.bf16 %v32_v12, %v32_v12 }
  0xd2   :  { %559 = vmatpush.bf16.msra.mxu0 %v498_v32  ;;  %610 = vmatpush.bf16.msra.mxu1 %v589_v33  ;;  %v682_v51 = vpop.permute.xlu1 %681  ;;  %v34_v33 = vld [vmem:[%s2440_s2] sm:$0xff] }
  0xd3   :  { %623 = vmatpush.bf16.msra.mxu2 %v592_v34  ;;  %636 = vmatpush.bf16.msra.mxu3 %v595_v35  ;;  %v779_v52 = vpop.permute.xlu0 %778  ;;  %v687_v56 = vsel %vm683_vm7, %v680_v47, %v682_v51  ;;  %v704_v60 = vsel %vm97_vm0, %v682_v51, 0  ;;  %v1937_v34 = vmov 0  }
  0xd4   :  { %v787_v57 = vsel %vm786_vm8, %v777_v55, %v779_v52  ;;  %v701_v59 = vsel %vm97_vm0, %v687_v56, 0  ;;  %v788_v3 = vsel %vm786_vm8, %v779_v52, %v781_v0  ;;  %1901 = vset.pattern.permute.xlu1 %v1937_v34  ;;  %1902 = vset.pattern.permute.xlu0 %v1937_v34 }
  0xd5   :  { %v795_v61 = vsel %vm97_vm0, %v787_v57, 0  ;;  %v798_v6 = vsel %vm97_vm0, %v788_v3, 0  ;;  %984 = vperm.xlu1 %1901, %v34_v33  }
  0xda   :  { %v785_v1 = vpop.permute.xlu1 %784 }
  0xdb   :  { %v783_v62 = vpop.permute.xlu0 %782  ;;  %v807_v8 = vsel %vm97_vm0, %v785_v1, 0 }
  0xdc   :  { %v789_v4 = vsel %vm786_vm8, %v781_v0, %v783_v62  ;;  %v790_v5 = vsel %vm786_vm8, %v783_v62, %v785_v1 }
  0xdd   :  { %v801_v7 = vsel %vm97_vm0, %v789_v4, 0  ;;  %v804_v9 = vsel %vm97_vm0, %v790_v5, 0 }
  0xe0   :  { %1832 = vmatmul.msk.bf16.vlgmr.msrb.gmra.mxu2 %vm93_vm2, %v60_v41  ;;  %1833 = vmatmul.msk.bf16.vlgmr.msrb.gmra.mxu3 %vm93_vm2, %v60_v41 }
  0xe1   :  { %1830 = vmatmul.msk.bf16.vlgmr.msrb.gmra.mxu0 %vm93_vm2, %v60_v41  ;;  %1831 = vmatmul.msk.bf16.vlgmr.msrb.gmra.mxu1 %vm93_vm2, %v60_v41 }
  0xe2   :  { %649 = vmatpush.bf16.msrb.mxu0 %v598_v45  ;;  %662 = vmatpush.bf16.msrb.mxu1 %v601_v46  ;;  %v884_v13 = vpop.permute.xlu1 %883  ;;  %v33_v45 = vld [vmem:[%s2439_s1 + $0x40] sm:$0xff] }
  0xe3   :  { %713 = vmatpush.bf16.msrb.mxu2 %v692_v48  ;;  %726 = vmatpush.bf16.msrb.mxu3 %v695_v49  ;;  %v882_v11 = vpop.permute.xlu0 %881  ;;  %v892_v19 = vsel %vm889_vm9, %v884_v13, %v886_v14  ;;  %v64_v48 = vpack.c.bf16 %v33_v45, %v33_v45 }
  0xe4   :  { %v890_v17 = vsel %vm889_vm9, %v880_v10, %v882_v11  ;;  %v891_v18 = vsel %vm889_vm9, %v882_v11, %v884_v13  ;;  %v904_v25 = vsel %vm97_vm0, %v892_v19, 0 }
  0xe5   :  { %v898_v23 = vsel %vm97_vm0, %v890_v17, 0  ;;  %v901_v24 = vsel %vm97_vm0, %v891_v18, 0 }
  0xeb   :  { %v888_v15 = vpop.permute.xlu0 %887 }
  0xec   :  { %v893_v20 = vsel %vm889_vm9, %v886_v14, %v888_v15  ;;  %v910_v38 = vsel %vm97_vm0, %v888_v15, 0 }
  0xed   :  { %v907_v26 = vsel %vm97_vm0, %v893_v20, 0 }
  0xf0   :  { %1836 = vmatmul.msk.bf16.vlgmr.msra.gmra.mxu2 %vm93_vm2, %v61_v53  ;;  %1837 = vmatmul.msk.bf16.vlgmr.msra.gmra.mxu3 %vm93_vm2, %v61_v53 }
  0xf1   :  { %1834 = vmatmul.msk.bf16.vlgmr.msra.gmra.mxu0 %vm93_vm2, %v60_v41  ;;  %1835 = vmatmul.msk.bf16.vlgmr.msra.gmra.mxu1 %vm93_vm2, %v61_v53 }
  0xf2   :  { %739 = vmatpush.bf16.msra.mxu0 %v698_v58  ;;  %752 = vmatpush.bf16.msra.mxu1 %v701_v59 }
  0xf3   :  { %765 = vmatpush.bf16.msra.mxu2 %v704_v60  ;;  %816 = vmatpush.bf16.msra.mxu3 %v795_v61 }
 0x100   :  { %1840 = vmatmul.msk.bf16.vlgmr.msrb.gmra.mxu2 %vm93_vm2, %v62_v2  ;;  %1841 = vmatmul.msk.bf16.vlgmr.msrb.gmra.mxu3 %vm93_vm2, %v62_v2 }
 0x101   :  { %1838 = vmatmul.msk.bf16.vlgmr.msrb.gmra.mxu0 %vm93_vm2, %v61_v53  ;;  %1839 = vmatmul.msk.bf16.vlgmr.msrb.gmra.mxu1 %vm93_vm2, %v61_v53 }
 0x102   :  { %829 = vmatpush.bf16.msrb.mxu0 %v798_v6  ;;  %842 = vmatpush.bf16.msrb.mxu1 %v801_v7 }
 0x103   :  { %855 = vmatpush.bf16.msrb.mxu2 %v804_v9  ;;  %868 = vmatpush.bf16.msrb.mxu3 %v807_v8 }
 0x10e   :  { %v122_v21 = vpop.f32.mrf.mxu0  ;;  %v135_v22 = vpop.f32.mrf.mxu1 }
 0x110   :  { %1844 = vmatmul.msk.bf16.vlgmr.msra.gmra.mxu2 %vm93_vm2, %v62_v2  ;;  %1845 = vmatmul.msk.bf16.vlgmr.msra.gmra.mxu3 %vm93_vm2, %v63_v16 }
 0x111   :  { %1842 = vmatmul.msk.bf16.vlgmr.msra.gmra.mxu0 %vm93_vm2, %v62_v2  ;;  %1843 = vmatmul.msk.bf16.vlgmr.msra.gmra.mxu1 %vm93_vm2, %v62_v2 }
 0x112   :  { %919 = vmatpush.bf16.msra.mxu0 %v898_v23  ;;  %932 = vmatpush.bf16.msra.mxu1 %v901_v24 }
 0x113   :  { %v148_v27 = vpop.f32.mrf.mxu2  ;;  %v161_v28 = vpop.f32.mrf.mxu3  ;;  %945 = vmatpush.bf16.msra.mxu2 %v904_v25  ;;  %958 = vmatpush.bf16.msra.mxu3 %v907_v26 }
 0x116   :  { %v124_v29 = vpop.f32.mrf.mxu0  ;;  %v137_v30 = vpop.f32.mrf.mxu1 }
 0x11b   :  { %v150_v31 = vpop.f32.mrf.mxu2  ;;  %v163_v32 = vpop.f32.mrf.mxu3 }
 0x11e   :  { %v174_v35 = vpop.f32.mrf.mxu0  ;;  %v205_v36 = vpop.f32.mrf.mxu1 }
 0x11f   :  { %v206_v37 = vadd.f32 %v205_v36, %v122_v21 }
 0x120   :  { %1848 = vmatmul.msk.bf16.vlgmr.msrb.gmra.mxu2 %vm93_vm2, %v63_v16  ;;  %1849 = vmatmul.msk.bf16.vlgmr.msrb.gmra.mxu3 %vm93_vm2, %v63_v16 }
 0x121   :  { %1846 = vmatmul.msk.bf16.vlgmr.msrb.gmra.mxu0 %vm93_vm2, %v63_v16  ;;  %1847 = vmatmul.msk.bf16.vlgmr.msrb.gmra.mxu1 %vm93_vm2, %v63_v16 }
 0x122   :  { %971 = vmatpush.bf16.msrb.mxu0 %v910_v38 }
 0x123   :  { %v218_v39 = vpop.f32.mrf.mxu2  ;;  %v231_v40 = vpop.f32.mrf.mxu3 }
 0x124   :  { %v219_v41 = vadd.f32 %v218_v39, %v135_v22  ;;  %v232_v42 = vadd.f32 %v231_v40, %v148_v27 }
 0x126   :  { %v176_v43 = vpop.f32.mrf.mxu0  ;;  %v207_v44 = vpop.f32.mrf.mxu1 }
 0x12b   :  { %v220_v46 = vpop.f32.mrf.mxu2  ;;  %v233_v47 = vpop.f32.mrf.mxu3 }
 0x12e   :  { %v244_v49 = vpop.f32.mrf.mxu0  ;;  %v257_v50 = vpop.f32.mrf.mxu1 }
 0x12f   :  { %v245_v51 = vadd.f32 %v244_v49, %v161_v28  ;;  %v258_v52 = vadd.f32 %v257_v50, %v174_v35 }
 0x130   :  { %1852 = vmatmul.msk.bf16.vlgmr.msra.gmra.mxu2 %vm93_vm2, %v64_v48  ;;  %1853 = vmatmul.msk.bf16.vlgmr.msra.gmra.mxu3 %vm93_vm2, %v64_v48 }
 0x131   :  { %1850 = vmatmul.msk.bf16.vlgmr.msra.gmra.mxu0 %vm93_vm2, %v64_v48  ;;  %1851 = vmatmul.msk.bf16.vlgmr.msra.gmra.mxu1 %vm93_vm2, %v64_v48 }
 0x133   :  { %v303_v53 = vpop.f32.mrf.mxu2  ;;  %v316_v54 = vpop.f32.mrf.mxu3 }
 0x134   :  { %v359_v55 = vadd.f32 %v303_v53, %v206_v37  ;;  %v360_v56 = vadd.f32 %v316_v54, %v219_v41 }
 0x136   :  { %v246_v57 = vpop.f32.mrf.mxu0  ;;  %v259_v58 = vpop.f32.mrf.mxu1 }
 0x13b   :  { %v305_v59 = vpop.f32.mrf.mxu2  ;;  %v318_v60 = vpop.f32.mrf.mxu3 }
 0x13e   :  { %v329_v61 = vpop.f32.mrf.mxu0  ;;  %v342_v62 = vpop.f32.mrf.mxu1 }
 0x13f   :  { %v361_v63 = vadd.f32 %v329_v61, %v232_v42  ;;  %v362_v0 = vadd.f32 %v342_v62, %v245_v51 }
 0x141   :  { %1854 = vmatmul.msk.bf16.vlgmr.msrb.gmra.mxu0 %vm93_vm2, %v64_v48 }
 0x143   :  { %v355_v1 = vpop.f32.mrf.mxu2  ;;  %v406_v2 = vpop.f32.mrf.mxu3 }
 0x144   :  { %v363_v3 = vadd.f32 %v355_v1, %v258_v52  ;;  %v462_v4 = vadd.f32 %v406_v2, %v359_v55 }
 0x146   :  { %v331_v5 = vpop.f32.mrf.mxu0  ;;  %v344_v6 = vpop.f32.mrf.mxu1 }
 0x14b   :  { %v357_v7 = vpop.f32.mrf.mxu2  ;;  %v408_v8 = vpop.f32.mrf.mxu3 }
 0x14c   :  { %v985_v8 = vpop.permute.xlu1 %984 }
 0x14e   :  { %v419_v9 = vpop.f32.mrf.mxu0  ;;  %v432_v10 = vpop.f32.mrf.mxu1 }
 0x14f   :  { %v463_v11 = vadd.f32 %v419_v9, %v360_v56  ;;  %v464_v12 = vadd.f32 %v432_v10, %v361_v63 }
 0x153   :  { %v445_v13 = vpop.f32.mrf.mxu2  ;;  %v458_v14 = vpop.f32.mrf.mxu3 }
 0x154   :  { %v465_v15 = vadd.f32 %v445_v13, %v362_v0  ;;  %v466_v16 = vadd.f32 %v458_v14, %v363_v3 }
 0x156   :  { %v421_v17 = vpop.f32.mrf.mxu0  ;;  %v434_v18 = vpop.f32.mrf.mxu1 }
 0x15b   :  { %v447_v19 = vpop.f32.mrf.mxu2  ;;  %v460_v20 = vpop.f32.mrf.mxu3 }
 0x15e   :  { %v509_v21 = vpop.f32.mrf.mxu0  ;;  %v522_v22 = vpop.f32.mrf.mxu1 }
 0x15f   :  { %v565_v23 = vadd.f32 %v509_v21, %v462_v4  ;;  %v566_v24 = vadd.f32 %v522_v22, %v463_v11 }
 0x163   :  { %v535_v25 = vpop.f32.mrf.mxu2  ;;  %v548_v26 = vpop.f32.mrf.mxu3 }
 0x164   :  { %v567_v27 = vadd.f32 %v535_v25, %v464_v12  ;;  %v568_v28 = vadd.f32 %v548_v26, %v465_v15 }
 0x166   :  { %v511_v29 = vpop.f32.mrf.mxu0  ;;  %v524_v30 = vpop.f32.mrf.mxu1 }
 0x16b   :  { %v537_v31 = vpop.f32.mrf.mxu2  ;;  %v550_v32 = vpop.f32.mrf.mxu3 }
 0x16e   :  { %v561_v33 = vpop.f32.mrf.mxu0  ;;  %v612_v34 = vpop.f32.mrf.mxu1 }
 0x16f   :  { %v2225_v35 = vadd.f32 %v561_v33, %v466_v16  ;;  %v668_v0 = vadd.f32 %v612_v34, %v565_v23 }
 0x173   :  { %v625_v36 = vpop.f32.mrf.mxu2  ;;  %v638_v37 = vpop.f32.mrf.mxu3 }
 0x174   :  { %v669_v1 = vadd.f32 %v625_v36, %v566_v24  ;;  %v670_v9 = vadd.f32 %v638_v37, %v567_v27 }
 0x176   :  { %v563_v38 = vpop.f32.mrf.mxu0  ;;  %v614_v39 = vpop.f32.mrf.mxu1 }
 0x17b   :  { %v627_v40 = vpop.f32.mrf.mxu2  ;;  %v640_v41 = vpop.f32.mrf.mxu3 }
 0x17e   :  { %v651_v42 = vpop.f32.mrf.mxu0  ;;  %v664_v43 = vpop.f32.mrf.mxu1 }
 0x17f   :  { %v671_v10 = vadd.f32 %v651_v42, %v568_v28  ;;  %v672_v36 = vadd.f32 %v664_v43, %v2225_v35 }
 0x183   :  { %v715_v44 = vpop.f32.mrf.mxu2  ;;  %v728_v45 = vpop.f32.mrf.mxu3 }
 0x184   :  { %v771_v2 = vadd.f32 %v715_v44, %v668_v0  ;;  %v772_v3 = vadd.f32 %v728_v45, %v669_v1  ;;  %v997_v1 = vld [vmem:[%s2441_s3] sm:$0xff] }
 0x186   :  { %v653_v46 = vpop.f32.mrf.mxu0  ;;  %v666_v47 = vpop.f32.mrf.mxu1 }
 0x18b   :  { %v717_v48 = vpop.f32.mrf.mxu2  ;;  %v730_v49 = vpop.f32.mrf.mxu3 }
 0x18e   :  { %v741_v50 = vpop.f32.mrf.mxu0  ;;  %v754_v51 = vpop.f32.mrf.mxu1 }
 0x18f   :  { %v773_v15 = vadd.f32 %v741_v50, %v670_v9  ;;  %v774_v16 = vadd.f32 %v754_v51, %v671_v10 }
 0x193   :  { %v767_v52 = vpop.f32.mrf.mxu2  ;;  %v818_v53 = vpop.f32.mrf.mxu3 }
 0x194   :  { %v874_v6 = vadd.f32 %v818_v53, %v771_v2  ;;  %v775_v39 = vadd.f32 %v767_v52, %v672_v36  ;;  %v1010_v2 = vpack.c.bf16 %v997_v1, %v997_v1 }
 0x196   :  { %v743_v54 = vpop.f32.mrf.mxu0  ;;  %v756_v55 = vpop.f32.mrf.mxu1 }
 0x19b   :  { %v769_v56 = vpop.f32.mrf.mxu2  ;;  %v820_v57 = vpop.f32.mrf.mxu3 }
 0x19e   :  { %v831_v58 = vpop.f32.mrf.mxu0  ;;  %v844_v59 = vpop.f32.mrf.mxu1 }
 0x19f   :  { %v875_v7 = vadd.f32 %v831_v58, %v772_v3  ;;  %v876_v19 = vadd.f32 %v844_v59, %v773_v15  ;;  %v998_v58 = vld [vmem:[%s2441_s3 + $0x8] sm:$0xff] }
 0x1a3   :  { %v857_v60 = vpop.f32.mrf.mxu2  ;;  %v870_v61 = vpop.f32.mrf.mxu3 }
 0x1a4   :  { %v877_v20 = vadd.f32 %v857_v60, %v774_v16  ;;  %v878_v45 = vadd.f32 %v870_v61, %v775_v39 }
 0x1a6   :  { %v833_v62 = vpop.f32.mrf.mxu0  ;;  %v846_v63 = vpop.f32.mrf.mxu1 }
 0x1a7   :  { %v1011_v62 = vpack.c.bf16 %v998_v58, %v998_v58 }
 0x1ab   :  { %v859_v4 = vpop.f32.mrf.mxu2  ;;  %v872_v5 = vpop.f32.mrf.mxu3 }
 0x1ae   :  { %v921_v11 = vpop.f32.mrf.mxu0  ;;  %v934_v12 = vpop.f32.mrf.mxu1 }
 0x1af   :  { %v977_v13 = vadd.f32 %v921_v11, %v874_v6  ;;  %v978_v14 = vadd.f32 %v934_v12, %v875_v7 }
 0x1b1   :  { %v987_v17 = vadd.f32 %v985_v8, %v977_v13  ;;  %v988_v18 = vadd.f32 %v985_v8, %v978_v14 }
 0x1b3   :  { %v992_v21 = vmax.f32 %v987_v17, 0.0  ;;  %v993_v22 = vmax.f32 %v988_v18, 0.0  ;;  %v947_v23 = vpop.f32.mrf.mxu2  ;;  %v960_v24 = vpop.f32.mrf.mxu3 }
 0x1b4   :  { %v979_v25 = vadd.f32 %v947_v23, %v876_v19  ;;  %v980_v26 = vadd.f32 %v960_v24, %v877_v20 }
 0x1b5   :  { %v1007_v29 = vpack.c.bf16 %v993_v22, %v992_v21  ;;  %v999_v22 = vld [vmem:[%s2441_s3 + $0x10] sm:$0xff] }
 0x1b6   :  { %v989_v30 = vadd.f32 %v985_v8, %v979_v25  ;;  %v990_v27 = vadd.f32 %v985_v8, %v980_v26  ;;  %v923_v28 = vpop.f32.mrf.mxu0  ;;  %v936_v31 = vpop.f32.mrf.mxu1 }
 0x1b7   :  { %v1023_v32 = vunpack.c.h.b16 %v1007_v29  ;;  %v1022_v46 = vunpack.c.l.b16 %v1007_v29  ;;  %v1012_v29 = vpack.c.bf16 %v999_v22, %v999_v22 }
 0x1b8   :  { %v994_v33 = vmax.f32 %v989_v30, 0.0  ;;  %v995_v34 = vmax.f32 %v990_v27, 0.0 }
 0x1b9   :  { %v2228_v37 = vpack.c.b16 %v1023_v32, %v1023_v32  ;;  %v1027_v35 = vpack.c.b16 %v1022_v46, %v1022_v46 }
 0x1ba   :  { %v1008_v38 = vpack.c.bf16 %v995_v34, %v994_v33 }
 0x1bb   :  { %1034 = vrot.lane.b32.xlu2 %v2228_v37, %s1929_s0  ;;  %v949_v40 = vpop.f32.mrf.mxu2  ;;  %v962_v41 = vpop.f32.mrf.mxu3  ;;  %v1119_v61 = vsel %vm1050_vm10, %v1027_v35, 0  ;;  %v1122_v10 = vsel %vm1050_vm10, %v2228_v37, 0 }
 0x1bc   :  { %v1024_v42 = vunpack.c.l.b16 %v1008_v38  ;;  %v1025_v44 = vunpack.c.h.b16 %v1008_v38 }
 0x1be   :  { %v2232_v47 = vpack.c.b16 %v1024_v42, %v1024_v42  ;;  %v2234_v48 = vpack.c.b16 %v1025_v44, %v1025_v44  ;;  %v973_v49 = vpop.f32.mrf.mxu0  ;;  %v1000_v42 = vld [vmem:[%s2441_s3 + $0x18] sm:$0xff] }
 0x1bf   :  { %v981_v50 = vadd.f32 %v973_v49, %v878_v45 }
 0x1c0   :  { %1038 = vrot.lane.b32.xlu1 %v2234_v48, %s1929_s0  ;;  %1036 = vrot.lane.b32.xlu0 %v2232_v47, %s1929_s0  ;;  %v1125_v11 = vsel %vm1050_vm10, %v2232_v47, 0  ;;  %v1128_v19 = vsel %vm1050_vm10, %v2234_v48, 0 }
 0x1c1   :  { %v991_v43 = vadd.f32 %v985_v8, %v981_v50 }
 0x1c3   :  { %v996_v51 = vmax.f32 %v991_v43, 0.0  ;;  %1032 = vrot.lane.b32.xlu2 %v1027_v35, %s1929_s0 }
 0x1c5   :  { %v1009_v52 = vpack.c.bf16 %v996_v51, %v996_v51 }
 0x1c6   :  { %v975_v53 = vpop.f32.mrf.mxu0 }
 0x1c7   :  { %v1026_v54 = vunpack.c.l.b16 %v1009_v52 }
 0x1c8   :  { %1184 = vrot.lane.b32.xlu1 %v2228_v37, %s1930_s24 }
 0x1c9   :  { %v1031_v55 = vpack.c.b16 %v1026_v54, %v1026_v54 }
 0x1cb   :  { %1040 = vrot.lane.b32.xlu0 %v1031_v55, %s1929_s0  ;;  %1186 = vrot.lane.b32.xlu2 %v2232_v47, %s1930_s24 }
 0x1d0   :  { %1182 = vrot.lane.b32.xlu1 %v1027_v35, %s1930_s24 }
 0x1d3   :  { %1188 = vrot.lane.b32.xlu0 %v2234_v48, %s1930_s24  ;;  %1190 = vrot.lane.b32.xlu2 %v1031_v55, %s1930_s24 }
 0x1d8   :  { %1271 = vrot.lane.b32.xlu1 %v2232_v47, %s1931_s25 }
 0x1db   :  { %1269 = vrot.lane.b32.xlu0 %v2228_v37, %s1931_s25  ;;  %1273 = vrot.lane.b32.xlu2 %v2234_v48, %s1931_s25 }
 0x1e0   :  { %1275 = vrot.lane.b32.xlu1 %v1031_v55, %s1931_s25 }
 0x1e3   :  { %1267 = vrot.lane.b32.xlu0 %v1027_v35, %s1931_s25  ;;  %1354 = vrot.lane.b32.xlu2 %v2228_v37, %s1932_s26 }
 0x1e8   :  { %1358 = vrot.lane.b32.xlu1 %v2234_v48, %s1932_s26 }
 0x1eb   :  { %1356 = vrot.lane.b32.xlu0 %v2232_v47, %s1932_s26  ;;  %1352 = vrot.lane.b32.xlu2 %v1027_v35, %s1932_s26 }
 0x1f0   :  { %1439 = vrot.lane.b32.xlu1 %v2228_v37, %s1933_s27 }
 0x1f3   :  { %1360 = vrot.lane.b32.xlu0 %v1031_v55, %s1932_s26  ;;  %1441 = vrot.lane.b32.xlu2 %v2232_v47, %s1933_s27 }
 0x1f8   :  { %1437 = vrot.lane.b32.xlu1 %v1027_v35, %s1933_s27 }
 0x1fb   :  { %1443 = vrot.lane.b32.xlu0 %v2234_v48, %s1933_s27  ;;  %1445 = vrot.lane.b32.xlu2 %v1031_v55, %s1933_s27 }
 0x200   :  { %1526 = vrot.lane.b32.xlu1 %v2232_v47, %s1934_s28 }
 0x203   :  { %1524 = vrot.lane.b32.xlu0 %v2228_v37, %s1934_s28  ;;  %1528 = vrot.lane.b32.xlu2 %v2234_v48, %s1934_s28 }
 0x208   :  { %1530 = vrot.lane.b32.xlu1 %v1031_v55, %s1934_s28 }
 0x20b   :  { %1522 = vrot.lane.b32.xlu0 %v1027_v35, %s1934_s28  ;;  %1609 = vrot.lane.b32.xlu2 %v2228_v37, %s1935_s29 }
 0x210   :  { %1613 = vrot.lane.b32.xlu1 %v2234_v48, %s1935_s29 }
 0x213   :  { %1611 = vrot.lane.b32.xlu0 %v2232_v47, %s1935_s29  ;;  %1607 = vrot.lane.b32.xlu2 %v1027_v35, %s1935_s29 }
 0x215   :  { %v1035_v56 = vpop.permute.xlu2 %1034 }
 0x218   :  { %1694 = vrot.lane.b32.xlu1 %v2228_v37, %s1936_s30 }
 0x21b   :  { %1615 = vrot.lane.b32.xlu0 %v1031_v55, %s1935_s29  ;;  %1696 = vrot.lane.b32.xlu2 %v2232_v47, %s1936_s30 }
 0x21d   :  { %v1033_v57 = vpop.permute.xlu2 %1032 }
 0x21e   :  { %v1042_v59 = vsel %vm88_vm1, %v1033_v57, %v1035_v56 }
 0x21f   :  { %v1052_v60 = vsel %vm1050_vm10, %v1042_v59, 0 }
 0x220   :  { %1070 = vmatpush.bf16.msrb.mxu1 %v1052_v60  ;;  %1692 = vrot.lane.b32.xlu1 %v1027_v35, %s1936_s30 }
 0x223   :  { %1698 = vrot.lane.b32.xlu0 %v2234_v48, %s1936_s30  ;;  %1700 = vrot.lane.b32.xlu2 %v1031_v55, %s1936_s30  ;;  %v1013_v48 = vpack.c.bf16 %v1000_v42, %v1000_v42 }
 0x224   :  { %1137 = vmatpush.bf16.msra.mxu1 %v1119_v61 }
 0x225   :  { %1855 = vmatmul.msk.bf16.vlgmr.msrb.gmra.mxu1 %vm1046_vm11, %v1011_v62  ;;  %v1187_v63 = vpop.permute.xlu2 %1186 }
 0x22d   :  { %v1191_v0 = vpop.permute.xlu2 %1190 }
 0x232   :  { %v1039_v3 = vpop.permute.xlu1 %1038  ;;  %v1037_v4 = vpop.permute.xlu0 %1036 }
 0x233   :  { %v1043_v5 = vsel %vm88_vm1, %v1035_v56, %v1037_v4  ;;  %v1044_v6 = vsel %vm88_vm1, %v1037_v4, %v1039_v3  ;;  %v1001_v56 = vld [vmem:[%s2441_s3 + $0x20] sm:$0xff] }
 0x234   :  { %v1055_v7 = vsel %vm1050_vm10, %v1043_v5, 0  ;;  %v1058_v8 = vsel %vm1050_vm10, %v1044_v6, 0 }
 0x235   :  { %1859 = vmatmul.msk.bf16.vlgmr.msra.gmra.mxu1 %vm1046_vm11, %v1010_v2  ;;  %v1274_v9 = vpop.permute.xlu2 %1273  ;;  %1083 = vmatpush.bf16.msrb.mxu2 %v1055_v7 }
 0x236   :  { %1096 = vmatpush.bf16.msrb.mxu3 %v1058_v8 }
 0x238   :  { %1856 = vmatmul.msk.bf16.vlgmr.msrb.gmra.mxu2 %vm1046_vm11, %v1011_v62 }
 0x239   :  { %1150 = vmatpush.bf16.msra.mxu2 %v1122_v10  ;;  %1857 = vmatmul.msk.bf16.vlgmr.msrb.gmra.mxu3 %vm1046_vm11, %v1011_v62  ;;  %v1002_v10 = vld [vmem:[%s2441_s3 + $0x28] sm:$0xff] }
 0x23a   :  { %1163 = vmatpush.bf16.msra.mxu3 %v1125_v11  ;;  %v1185_v12 = vpop.permute.xlu1 %1184 }
 0x23b   :  { %v1193_v13 = vsel %vm271_vm3, %v1185_v12, %v1187_v63 }
 0x23c   :  { %v1203_v14 = vsel %vm1050_vm10, %v1193_v13, 0 }
 0x23d   :  { %v1041_v15 = vpop.permute.xlu0 %1040  ;;  %1231 = vmatpush.bf16.msrb.mxu2 %v1203_v14  ;;  %v1355_v17 = vpop.permute.xlu2 %1354 }
 0x23e   :  { %v1045_v16 = vsel %vm88_vm1, %v1039_v3, %v1041_v15  ;;  %v1015_v15 = vpack.c.bf16 %v1002_v10, %v1002_v10 }
 0x23f   :  { %v1061_v18 = vsel %vm1050_vm10, %v1045_v16, 0 }
 0x240   :  { %1109 = vmatpush.bf16.msra.mxu0 %v1061_v18 }
 0x242   :  { %v1183_v20 = vpop.permute.xlu1 %1182 }
 0x243   :  { %1858 = vmatmul.msk.bf16.vlgmr.msra.gmra.mxu0 %vm1046_vm11, %v1011_v62  ;;  %v1192_v21 = vsel %vm271_vm3, %v1183_v20, %v1185_v12  ;;  %v1014_v62 = vpack.c.bf16 %v1001_v56, %v1001_v56 }
 0x244   :  { %1176 = vmatpush.bf16.msrb.mxu0 %v1128_v19  ;;  %v1200_v23 = vsel %vm1050_vm10, %v1192_v21, 0 }
 0x245   :  { %v1189_v24 = vpop.permute.xlu0 %1188  ;;  %1218 = vmatpush.bf16.msrb.mxu1 %v1200_v23  ;;  %v1353_v28 = vpop.permute.xlu2 %1352 }
 0x246   :  { %v1194_v25 = vsel %vm271_vm3, %v1187_v63, %v1189_v24  ;;  %v1195_v26 = vsel %vm271_vm3, %v1189_v24, %v1191_v0  ;;  %v1362_v45 = vsel %vm477_vm5, %v1353_v28, %v1355_v17 }
 0x247   :  { %v1206_v30 = vsel %vm1050_vm10, %v1194_v25, 0  ;;  %v1209_v27 = vsel %vm1050_vm10, %v1195_v26, 0  ;;  %v1370_v49 = vsel %vm1050_vm10, %v1362_v45, 0 }
 0x248   :  { %1244 = vmatpush.bf16.msrb.mxu3 %v1206_v30  ;;  %1257 = vmatpush.bf16.msra.mxu0 %v1209_v27 }
 0x249   :  { %1860 = vmatmul.msk.bf16.vlgmr.msra.gmra.mxu2 %vm1046_vm11, %v1010_v2  ;;  %1861 = vmatmul.msk.bf16.vlgmr.msra.gmra.mxu3 %vm1046_vm11, %v1010_v2 }
 0x24a   :  { %v1272_v31 = vpop.permute.xlu1 %1271  ;;  %1863 = vmatmul.msk.bf16.vlgmr.msrb.gmra.mxu1 %vm1046_vm11, %v1012_v29 }
 0x24b   :  { %v1279_v32 = vsel %vm374_vm4, %v1272_v31, %v1274_v9 }
 0x24c   :  { %v1291_v33 = vsel %vm1050_vm10, %v1279_v32, 0 }
 0x24d   :  { %v1270_v34 = vpop.permute.xlu0 %1269  ;;  %1329 = vmatpush.bf16.msra.mxu3 %v1291_v33  ;;  %v1442_v38 = vpop.permute.xlu2 %1441 }
 0x24e   :  { %v1278_v36 = vsel %vm374_vm4, %v1270_v34, %v1272_v31 }
 0x24f   :  { %v1288_v37 = vsel %vm1050_vm10, %v1278_v36, 0 }
 0x250   :  { %1316 = vmatpush.bf16.msra.mxu2 %v1288_v37 }
 0x252   :  { %v1276_v39 = vpop.permute.xlu1 %1275 }
 0x253   :  { %1862 = vmatmul.msk.bf16.vlgmr.msrb.gmra.mxu0 %vm1046_vm11, %v1010_v2  ;;  %v1280_v40 = vsel %vm374_vm4, %v1274_v9, %v1276_v39 }
 0x254   :  { %v1294_v41 = vsel %vm1050_vm10, %v1280_v40, 0 }
 0x255   :  { %v1268_v44 = vpop.permute.xlu0 %1267  ;;  %1342 = vmatpush.bf16.msrb.mxu0 %v1294_v41  ;;  %v1446_v35 = vpop.permute.xlu2 %1445  ;;  %v1006_v41 = vld [vmem:[%s2442_s4] sm:$0xff] }
 0x256   :  { %v1277_v46 = vsel %vm374_vm4, %v1268_v44, %v1270_v34  ;;  %v1004_v44 = vld [vmem:[%s2441_s3 + $0x38] sm:$0xff]  ;;  %1779 = vperm.xlu0 %1902, %v1006_v41  }
 0x257   :  { %v1285_v47 = vsel %vm1050_vm10, %v1277_v46, 0 }
 0x258   :  { %1303 = vmatpush.bf16.msra.mxu1 %v1285_v47 }
 0x259   :  { %1864 = vmatmul.msk.bf16.vlgmr.msrb.gmra.mxu2 %vm1046_vm11, %v1012_v29  ;;  %1865 = vmatmul.msk.bf16.vlgmr.msrb.gmra.mxu3 %vm1046_vm11, %v1012_v29 }
 0x25a   :  { %v1359_v50 = vpop.permute.xlu1 %1358 }
 0x25b   :  { %1867 = vmatmul.msk.bf16.vlgmr.msra.gmra.mxu1 %vm1046_vm11, %v1013_v48 }
 0x25c   :  { %1388 = vmatpush.bf16.msrb.mxu1 %v1370_v49 }
 0x25d   :  { %v1357_v43 = vpop.permute.xlu0 %1356  ;;  %v1529_v58 = vpop.permute.xlu2 %1528 }
 0x25e   :  { %v1363_v51 = vsel %vm477_vm5, %v1355_v17, %v1357_v43  ;;  %v1364_v52 = vsel %vm477_vm5, %v1357_v43, %v1359_v50 }
 0x25f   :  { %v1373_v53 = vsel %vm1050_vm10, %v1363_v51, 0  ;;  %v1376_v54 = vsel %vm1050_vm10, %v1364_v52, 0 }
 0x260   :  { %1401 = vmatpush.bf16.msrb.mxu2 %v1373_v53  ;;  %1414 = vmatpush.bf16.msrb.mxu3 %v1376_v54  ;;  %v1005_v54 = vld [vmem:[%s2441_s3 + $0x40] sm:$0xff] }
 0x262   :  { %v1440_v55 = vpop.permute.xlu1 %1439 }
 0x263   :  { %1866 = vmatmul.msk.bf16.vlgmr.msra.gmra.mxu0 %vm1046_vm11, %v1012_v29  ;;  %v1448_v59 = vsel %vm580_vm6, %v1440_v55, %v1442_v38  ;;  %v1003_v29 = vld [vmem:[%s2441_s3 + $0x30] sm:$0xff]  ;;  %s1938_s3 = smov [#allocation2]  }
 0x264   :  { %v1458_v63 = vsel %vm1050_vm10, %v1448_v59, 0  ;;  %v1016_v33 = vpack.c.bf16 %v1003_v29, %v1003_v29  ;;  %s1799_s17 = sshll.u32 %s1938_s3, 4  ;;  %s1800_s17 = int_to_ptr.vmem [resolvable:$true] %s1799_s17 }
 0x265   :  { %v1361_v57 = vpop.permute.xlu0 %1360  ;;  %v1610_v6 = vpop.permute.xlu2 %1609 }
 0x266   :  { %v1365_v60 = vsel %vm477_vm5, %v1359_v50, %v1361_v57  ;;  %v1017_v50 = vpack.c.bf16 %v1004_v44, %v1004_v44 }
 0x267   :  { %v1379_v61 = vsel %vm1050_vm10, %v1365_v60, 0 }
 0x268   :  { %1427 = vmatpush.bf16.msra.mxu0 %v1379_v61 }
 0x269   :  { %1868 = vmatmul.msk.bf16.vlgmr.msra.gmra.mxu2 %vm1046_vm11, %v1013_v48  ;;  %1869 = vmatmul.msk.bf16.vlgmr.msra.gmra.mxu3 %vm1046_vm11, %v1013_v48 }
 0x26a   :  { %1486 = vmatpush.bf16.msra.mxu2 %v1458_v63  ;;  %v1438_v0 = vpop.permute.xlu1 %1437 }
 0x26b   :  { %v1447_v1 = vsel %vm580_vm6, %v1438_v0, %v1440_v55  ;;  %1871 = vmatmul.msk.bf16.vlgmr.msrb.gmra.mxu1 %vm1046_vm11, %v1014_v62  ;;  %v1018_v55 = vpack.c.bf16 %v1005_v54, %v1005_v54 }
 0x26c   :  { %v1455_v2 = vsel %vm1050_vm10, %v1447_v1, 0 }
 0x26d   :  { %v1444_v3 = vpop.permute.xlu0 %1443  ;;  %1473 = vmatpush.bf16.msra.mxu1 %v1455_v2  ;;  %v1608_v17 = vpop.permute.xlu2 %1607 }
 0x26e   :  { %v1449_v4 = vsel %vm580_vm6, %v1442_v38, %v1444_v3  ;;  %v1450_v7 = vsel %vm580_vm6, %v1444_v3, %v1446_v35  ;;  %v1617_v19 = vsel %vm786_vm8, %v1608_v17, %v1610_v6 }
 0x26f   :  { %v1461_v5 = vsel %vm1050_vm10, %v1449_v4, 0  ;;  %v1464_v9 = vsel %vm1050_vm10, %v1450_v7, 0  ;;  %v1625_v23 = vsel %vm1050_vm10, %v1617_v19, 0 }
 0x270   :  { %1499 = vmatpush.bf16.msra.mxu3 %v1461_v5 }
 0x272   :  { %v1527_v8 = vpop.permute.xlu1 %1526 }
 0x273   :  { %1870 = vmatmul.msk.bf16.vlgmr.msrb.gmra.mxu0 %vm1046_vm11, %v1013_v48  ;;  %v1534_v12 = vsel %vm683_vm7, %v1527_v8, %v1529_v58 }
 0x274   :  { %1512 = vmatpush.bf16.msrb.mxu0 %v1464_v9  ;;  %v1546_v16 = vsel %vm1050_vm10, %v1534_v12, 0 }
 0x275   :  { %v1525_v11 = vpop.permute.xlu0 %1524  ;;  %v1697_v45 = vpop.permute.xlu2 %1696 }
 0x276   :  { %v1533_v13 = vsel %vm683_vm7, %v1525_v11, %v1527_v8 }
 0x277   :  { %v1543_v14 = vsel %vm1050_vm10, %v1533_v13, 0 }
 0x279   :  { %1872 = vmatmul.msk.bf16.vlgmr.msrb.gmra.mxu2 %vm1046_vm11, %v1014_v62  ;;  %1873 = vmatmul.msk.bf16.vlgmr.msrb.gmra.mxu3 %vm1046_vm11, %v1014_v62 }
 0x27a   :  { %1571 = vmatpush.bf16.msrb.mxu2 %v1543_v14  ;;  %1584 = vmatpush.bf16.msrb.mxu3 %v1546_v16  ;;  %v1531_v18 = vpop.permute.xlu1 %1530 }
 0x27b   :  { %1875 = vmatmul.msk.bf16.vlgmr.msra.gmra.mxu1 %vm1046_vm11, %v1015_v15  ;;  %v1535_v24 = vsel %vm683_vm7, %v1529_v58, %v1531_v18 }
 0x27c   :  { %v1549_v26 = vsel %vm1050_vm10, %v1535_v24, 0 }
 0x27d   :  { %v1523_v20 = vpop.permute.xlu0 %1522  ;;  %v1701_v43 = vpop.permute.xlu2 %1700 }
 0x27e   :  { %v1532_v21 = vsel %vm683_vm7, %v1523_v20, %v1525_v11 }
 0x27f   :  { %v1540_v22 = vsel %vm1050_vm10, %v1532_v21, 0 }
 0x280   :  { %1558 = vmatpush.bf16.msrb.mxu1 %v1540_v22 }
 0x282   :  { %v1614_v25 = vpop.permute.xlu1 %1613 }
 0x283   :  { %1874 = vmatmul.msk.bf16.vlgmr.msra.gmra.mxu0 %vm1046_vm11, %v1014_v62 }
 0x284   :  { %1643 = vmatpush.bf16.msra.mxu1 %v1625_v23  ;;  %1597 = vmatpush.bf16.msra.mxu0 %v1549_v26 }
 0x285   :  { %v1612_v30 = vpop.permute.xlu0 %1611 }
 0x286   :  { %v1618_v27 = vsel %vm786_vm8, %v1610_v6, %v1612_v30  ;;  %v1619_v28 = vsel %vm786_vm8, %v1612_v30, %v1614_v25 }
 0x287   :  { %v1628_v31 = vsel %vm1050_vm10, %v1618_v27, 0  ;;  %v1631_v32 = vsel %vm1050_vm10, %v1619_v28, 0 }
 0x289   :  { %1876 = vmatmul.msk.bf16.vlgmr.msra.gmra.mxu2 %vm1046_vm11, %v1015_v15  ;;  %1877 = vmatmul.msk.bf16.vlgmr.msra.gmra.mxu3 %vm1046_vm11, %v1015_v15 }
 0x28a   :  { %1656 = vmatpush.bf16.msra.mxu2 %v1628_v31  ;;  %1669 = vmatpush.bf16.msra.mxu3 %v1631_v32  ;;  %v1695_v34 = vpop.permute.xlu1 %1694 }
 0x28b   :  { %1879 = vmatmul.msk.bf16.vlgmr.msrb.gmra.mxu1 %vm1046_vm11, %v1016_v33  ;;  %v1703_v47 = vsel %vm889_vm9, %v1695_v34, %v1697_v45 }
 0x28c   :  { %v1713_v35 = vsel %vm1050_vm10, %v1703_v47, 0 }
 0x28d   :  { %v1616_v36 = vpop.permute.xlu0 %1615 }
 0x28e   :  { %v1620_v37 = vsel %vm786_vm8, %v1614_v25, %v1616_v36 }
 0x28f   :  { %v1634_v39 = vsel %vm1050_vm10, %v1620_v37, 0 }
 0x292   :  { %v1693_v38 = vpop.permute.xlu1 %1692 }
 0x293   :  { %v1702_v40 = vsel %vm889_vm9, %v1693_v38, %v1695_v34  ;;  %1878 = vmatmul.msk.bf16.vlgmr.msrb.gmra.mxu0 %vm1046_vm11, %v1015_v15 }
 0x294   :  { %v1710_v42 = vsel %vm1050_vm10, %v1702_v40, 0  ;;  %1682 = vmatpush.bf16.msrb.mxu0 %v1634_v39 }
 0x295   :  { %v1699_v46 = vpop.permute.xlu0 %1698  ;;  %1728 = vmatpush.bf16.msrb.mxu1 %v1710_v42 }
 0x296   :  { %v1704_v48 = vsel %vm889_vm9, %v1697_v45, %v1699_v46  ;;  %v1705_v51 = vsel %vm889_vm9, %v1699_v46, %v1701_v43 }
 0x297   :  { %v1716_v49 = vsel %vm1050_vm10, %v1704_v48, 0  ;;  %v1719_v53 = vsel %vm1050_vm10, %v1705_v51, 0 }
 0x299   :  { %1880 = vmatmul.msk.bf16.vlgmr.msrb.gmra.mxu2 %vm1046_vm11, %v1016_v33  ;;  %1881 = vmatmul.msk.bf16.vlgmr.msrb.gmra.mxu3 %vm1046_vm11, %v1016_v33 }
 0x29a   :  { %1741 = vmatpush.bf16.msrb.mxu2 %v1713_v35  ;;  %1754 = vmatpush.bf16.msrb.mxu3 %v1716_v49 }
 0x29b   :  { %1883 = vmatmul.msk.bf16.vlgmr.msra.gmra.mxu1 %vm1046_vm11, %v1017_v50 }
 0x2a2   :  { %v1072_v52 = vpop.f32.mrf.mxu1 }
 0x2a3   :  { %1882 = vmatmul.msk.bf16.vlgmr.msra.gmra.mxu0 %vm1046_vm11, %v1016_v33 }
 0x2a4   :  { %1767 = vmatpush.bf16.msra.mxu0 %v1719_v53 }
 0x2a9   :  { %1884 = vmatmul.msk.bf16.vlgmr.msra.gmra.mxu2 %vm1046_vm11, %v1017_v50  ;;  %1885 = vmatmul.msk.bf16.vlgmr.msra.gmra.mxu3 %vm1046_vm11, %v1017_v50 }
 0x2aa   :  { %v1074_v56 = vpop.f32.mrf.mxu1 }
 0x2ab   :  { %1887 = vmatmul.msk.bf16.vlgmr.msrb.gmra.mxu1 %vm1046_vm11, %v1018_v55 }
 0x2b2   :  { %v1139_v57 = vpop.f32.mrf.mxu1 }
 0x2b3   :  { %v1140_v58 = vadd.f32 %v1139_v57, %v1072_v52  ;;  %1886 = vmatmul.msk.bf16.vlgmr.msrb.gmra.mxu0 %vm1046_vm11, %v1017_v50 }
 0x2b9   :  { %1888 = vmatmul.msk.bf16.vlgmr.msrb.gmra.mxu2 %vm1046_vm11, %v1018_v55  ;;  %1889 = vmatmul.msk.bf16.vlgmr.msrb.gmra.mxu3 %vm1046_vm11, %v1018_v55 }
 0x2ba   :  { %v1141_v59 = vpop.f32.mrf.mxu1 }
 0x2bb   :  { %v1085_v60 = vpop.f32.mrf.mxu2 }
 0x2bc   :  { %v1098_v61 = vpop.f32.mrf.mxu3 }
 0x2c0   :  { %v1111_v62 = vpop.f32.mrf.mxu0 }
 0x2c3   :  { %1890 = vmatmul.msk.bf16.vlgmr.msra.gmra.mxu0 %vm1046_vm11, %v1018_v55  ;;  %v1087_v63 = vpop.f32.mrf.mxu2 }
 0x2c4   :  { %v1100_v0 = vpop.f32.mrf.mxu3 }
 0x2c7   :  { %v1220_v1 = vpop.f32.mrf.mxu1 }
 0x2c8   :  { %v1113_v2 = vpop.f32.mrf.mxu0  ;;  %v1263_v3 = vadd.f32 %v1220_v1, %v1140_v58  ;;  %v1780_v0 = vpop.permute.xlu0 %1779 }
 0x2cc   :  { %v1152_v4 = vpop.f32.mrf.mxu2  ;;  %v1165_v5 = vpop.f32.mrf.mxu3 }
 0x2cd   :  { %v1153_v6 = vadd.f32 %v1152_v4, %v1085_v60  ;;  %v1166_v7 = vadd.f32 %v1165_v5, %v1098_v61 }
 0x2cf   :  { %v1222_v8 = vpop.f32.mrf.mxu1 }
 0x2d0   :  { %v1178_v9 = vpop.f32.mrf.mxu0 }
 0x2d1   :  { %v1179_v10 = vadd.f32 %v1178_v9, %v1111_v62 }
 0x2d4   :  { %v1154_v11 = vpop.f32.mrf.mxu2  ;;  %v1167_v12 = vpop.f32.mrf.mxu3 }
 0x2d8   :  { %v1180_v13 = vpop.f32.mrf.mxu0  ;;  %v1305_v14 = vpop.f32.mrf.mxu1 }
 0x2d9   :  { %v1348_v15 = vadd.f32 %v1305_v14, %v1263_v3 }
 0x2dc   :  { %v1233_v16 = vpop.f32.mrf.mxu2  ;;  %v1246_v17 = vpop.f32.mrf.mxu3 }
 0x2dd   :  { %v1264_v18 = vadd.f32 %v1233_v16, %v1153_v6  ;;  %v1265_v19 = vadd.f32 %v1246_v17, %v1166_v7 }
 0x2e0   :  { %v1259_v20 = vpop.f32.mrf.mxu0  ;;  %v1307_v21 = vpop.f32.mrf.mxu1 }
 0x2e1   :  { %v1266_v22 = vadd.f32 %v1259_v20, %v1179_v10 }
 0x2e4   :  { %v1235_v23 = vpop.f32.mrf.mxu2  ;;  %v1248_v24 = vpop.f32.mrf.mxu3 }
 0x2e8   :  { %v1261_v25 = vpop.f32.mrf.mxu0  ;;  %v1390_v26 = vpop.f32.mrf.mxu1 }
 0x2e9   :  { %v1433_v58 = vadd.f32 %v1390_v26, %v1348_v15 }
 0x2ec   :  { %v1318_v29 = vpop.f32.mrf.mxu2  ;;  %v1331_v30 = vpop.f32.mrf.mxu3 }
 0x2ed   :  { %v1349_v27 = vadd.f32 %v1318_v29, %v1264_v18  ;;  %v1350_v28 = vadd.f32 %v1331_v30, %v1265_v19 }
 0x2f0   :  { %v1344_v31 = vpop.f32.mrf.mxu0  ;;  %v1392_v32 = vpop.f32.mrf.mxu1 }
 0x2f1   :  { %v1351_v33 = vadd.f32 %v1344_v31, %v1266_v22 }
 0x2f4   :  { %v1320_v34 = vpop.f32.mrf.mxu2  ;;  %v1333_v36 = vpop.f32.mrf.mxu3 }
 0x2f8   :  { %v1346_v37 = vpop.f32.mrf.mxu0  ;;  %v1475_v38 = vpop.f32.mrf.mxu1 }
 0x2f9   :  { %v1518_v59 = vadd.f32 %v1475_v38, %v1433_v58 }
 0x2fc   :  { %v1403_v39 = vpop.f32.mrf.mxu2  ;;  %v1416_v40 = vpop.f32.mrf.mxu3 }
 0x2fd   :  { %v1434_v12 = vadd.f32 %v1403_v39, %v1349_v27  ;;  %v1435_v13 = vadd.f32 %v1416_v40, %v1350_v28 }
 0x300   :  { %v1429_v41 = vpop.f32.mrf.mxu0  ;;  %v1477_v42 = vpop.f32.mrf.mxu1 }
 0x301   :  { %v1436_v17 = vadd.f32 %v1429_v41, %v1351_v33 }
 0x304   :  { %v1405_v44 = vpop.f32.mrf.mxu2  ;;  %v1418_v45 = vpop.f32.mrf.mxu3 }
 0x308   :  { %v1431_v46 = vpop.f32.mrf.mxu0  ;;  %v1560_v47 = vpop.f32.mrf.mxu1 }
 0x309   :  { %v1603_v62 = vadd.f32 %v1560_v47, %v1518_v59 }
 0x30c   :  { %v1488_v48 = vpop.f32.mrf.mxu2  ;;  %v1501_v49 = vpop.f32.mrf.mxu3 }
 0x30d   :  { %v1519_v14 = vadd.f32 %v1488_v48, %v1434_v12  ;;  %v1520_v15 = vadd.f32 %v1501_v49, %v1435_v13 }
 0x310   :  { %v1514_v50 = vpop.f32.mrf.mxu0  ;;  %v1562_v35 = vpop.f32.mrf.mxu1 }
 0x311   :  { %v1521_v20 = vadd.f32 %v1514_v50, %v1436_v17 }
 0x314   :  { %v1490_v43 = vpop.f32.mrf.mxu2  ;;  %v1503_v51 = vpop.f32.mrf.mxu3 }
 0x318   :  { %v1516_v52 = vpop.f32.mrf.mxu0  ;;  %v1645_v53 = vpop.f32.mrf.mxu1 }
 0x319   :  { %v1688_v63 = vadd.f32 %v1645_v53, %v1603_v62 }
 0x31c   :  { %v1573_v54 = vpop.f32.mrf.mxu2  ;;  %v1586_v55 = vpop.f32.mrf.mxu3 }
 0x31d   :  { %v1604_v18 = vadd.f32 %v1573_v54, %v1519_v14  ;;  %v1605_v19 = vadd.f32 %v1586_v55, %v1520_v15 }
 0x320   :  { %v1599_v56 = vpop.f32.mrf.mxu0  ;;  %v1647_v57 = vpop.f32.mrf.mxu1 }
 0x321   :  { %v1606_v25 = vadd.f32 %v1599_v56, %v1521_v20 }
 0x324   :  { %v1575_v60 = vpop.f32.mrf.mxu2  ;;  %v1588_v61 = vpop.f32.mrf.mxu3 }
 0x328   :  { %v1601_v1 = vpop.f32.mrf.mxu0  ;;  %v1730_v2 = vpop.f32.mrf.mxu1 }
 0x329   :  { %v1773_v3 = vadd.f32 %v1730_v2, %v1688_v63 }
 0x32b   :  { %v1782_v4 = vadd.f32 %v1780_v0, %v1773_v3 }
 0x32c   :  { %v1658_v5 = vpop.f32.mrf.mxu2  ;;  %v1671_v6 = vpop.f32.mrf.mxu3 }
 0x32d   :  { %v1786_v7 = vmax.f32 %v1782_v4, 0.0  ;;  %v1689_v21 = vadd.f32 %v1658_v5, %v1604_v18  ;;  %v1690_v22 = vadd.f32 %v1671_v6, %v1605_v19 }
 0x32f   :  { %1790 = vst [vmem:[#allocation2] sm:$0xff] %v1786_v7 }
 0x330   :  { %v1684_v8 = vpop.f32.mrf.mxu0  ;;  %v1732_v9 = vpop.f32.mrf.mxu1 }
 0x331   :  { %v1691_v30 = vadd.f32 %v1684_v8, %v1606_v25 }
 0x334   :  { %v1660_v10 = vpop.f32.mrf.mxu2  ;;  %v1673_v11 = vpop.f32.mrf.mxu3 }
 0x338   :  { %v1686_v16 = vpop.f32.mrf.mxu0 }
 0x33c   :  { %v1743_v23 = vpop.f32.mrf.mxu2  ;;  %v1756_v24 = vpop.f32.mrf.mxu3 }
 0x33d   :  { %v1774_v26 = vadd.f32 %v1743_v23, %v1689_v21  ;;  %v1775_v29 = vadd.f32 %v1756_v24, %v1690_v22 }
 0x33f   :  { %v1783_v31 = vadd.f32 %v1780_v0, %v1774_v26  ;;  %v1784_v32 = vadd.f32 %v1780_v0, %v1775_v29 }
 0x340   :  { %v1769_v34 = vpop.f32.mrf.mxu0 }
 0x341   :  { %v1787_v27 = vmax.f32 %v1783_v31, 0.0  ;;  %v1788_v28 = vmax.f32 %v1784_v32, 0.0  ;;  %v1776_v36 = vadd.f32 %v1769_v34, %v1691_v30 }
 0x343   :  { %1791 = vst [vmem:[#allocation2 + $0x8] sm:$0xff] %v1787_v27  ;;  %v1785_v33 = vadd.f32 %v1780_v0, %v1776_v36 }
 0x344   :  { %1792 = vst [vmem:[#allocation2 + $0x10] sm:$0xff] %v1788_v28  ;;  %v1745_v37 = vpop.f32.mrf.mxu2  ;;  %v1758_v38 = vpop.f32.mrf.mxu3 }
 0x345   :  { %v1789_v39 = vmax.f32 %v1785_v33, 0.0 }
 0x347   :  { %1793 = vst [vmem:[#allocation2 + $0x18] sm:$0xff] %v1789_v39 }
 0x348   :  { %v1771_v40 = vpop.f32.mrf.mxu0  ;;  %1804 = dma.vmem_to_hbm [thread:$0]  %s1800_s17, 512, %s1802_s20, [#allocation3]  }
 0x349   :  { %1927 = dma.done.wait [#allocation3], 512  }
 0x34a   :  { %1928 = vsyncadd [#allocation3], 4294966784 }
 0x34b   :  { %1809 = vsyncpa [#allocation3], 1 }

</bundles_post_ra>
